<compile_context>
chip_gen: v6e
topology: v6e:2x2x1
jax: 0.10.0
libtpu: 0.0.40
codegen_flags: <defaults>
</compile_context>

<pallas_src>
import functools

import jax
import jax.numpy as jnp
from jax.experimental import pallas as pl
from jax.experimental.pallas import tpu as pltpu

LANE = 128
# bf16-native MXU on v5e/v6e/v7x; accumulation is always float32.
MXU_DTYPE = jnp.bfloat16


def _round_up(x, m):
    return (x + m - 1) // m * m


def down_kernel(x_ref, w1_ref, b1_ref, w2_ref, b2_ref, out_ref, *, H2, W2):
    Cin = x_ref.shape[-1]      # lane-padded channel counts
    Cmid = w1_ref.shape[-1]
    Cout = w2_ref.shape[-1]
    H, W = 2 * H2, 2 * W2

    # --- MaxPool2d(2), fully in-kernel --------------------------------------
    x = x_ref[...]                                    # (H, W, Cin)
    x4 = x.reshape(H2, 2, W, Cin)                     # outer-dim split (no lane change)
    xr = jnp.maximum(x4[:, 0], x4[:, 1])              # (H2, W, Cin): pooled over H
    xw = xr.reshape(H2, W2, 2, Cin)                   # adjacent-column pairs
    pooled = jnp.maximum(xw[:, :, 0], xw[:, :, 1])    # (H2, W2, Cin): pooled over W

    # --- 3x3 "same" conv as ONE im2col matmul on the MXU --------------------
    def conv3x3_bias_relu(inp, w_ref, b_ref):
        # inp: (H2, W2, C) in MXU_DTYPE, C a multiple of 128.
        # Zero-pad as a value (concat of zero strips): no scratch ref, no
        # store->reload round trip, no halo zeroing.
        C = inp.shape[-1]
        zrow = jnp.zeros((1, W2, C), inp.dtype)
        t = jnp.concatenate([zrow, inp, zrow], axis=0)            # (H2+2, W2, C)
        zcol = jnp.zeros((H2 + 2, 1, C), inp.dtype)
        pv = jnp.concatenate([zcol, t, zcol], axis=1)             # (H2+2, W2+2, C)
        taps = [pv[dy:dy + H2, dx:dx + W2, :]                     # 9 shifted views
                for dy in range(3) for dx in range(3)]
        col = jnp.concatenate(taps, axis=-1)                      # (H2, W2, 9C), lane-aligned
        col = col.reshape(H2 * W2, 9 * C)                         # im2col operand, K = 9C (bf16)
        acc = jnp.dot(col, w_ref[...],                            # bf16 x bf16 -> f32 on MXU
                      preferred_element_type=jnp.float32)         # (H2*W2, Cout)
        # BN scale is already folded into the weights: bias + ReLU only.
        return jnp.maximum(acc + b_ref[...], 0.0)

    # conv1 -> (folded BN) -> ReLU
    h1 = conv3x3_bias_relu(pooled.astype(MXU_DTYPE), w1_ref, b1_ref)        # (H2*W2, Cmid) f32
    # conv2 -> (folded BN) -> ReLU
    h2 = conv3x3_bias_relu(h1.reshape(H2, W2, Cmid).astype(MXU_DTYPE),
                           w2_ref, b2_ref)                                  # (H2*W2, Cout) f32

    # --- single full-block, unmasked, lane-dense store -----------------------
    out_ref[...] = h2.astype(out_ref.dtype)


def down_forward(x_nchw, w1, s1, b1, w2, s2, b2):
    """x_nchw: (N, Cin, H, W) -> (N, Cout, H//2, W//2), matching Down.forward (eval BN)."""
    N, Cin, H, W = x_nchw.shape
    assert H % 2 == 0 and W % 2 == 0
    H2, W2 = H // 2, W // 2
    Cmid, Cout = w1.shape[-1], w2.shape[-1]

    # Lane-dense channel padding (no-op when C is already a multiple of 128).
    cin_p, cmid_p, cout_p = (_round_up(c, LANE) for c in (Cin, Cmid, Cout))

    x = jnp.transpose(x_nchw, (0, 2, 3, 1))                        # NHWC
    if cin_p != Cin:
        x = jnp.pad(x, ((0, 0), (0, 0), (0, 0), (0, cin_p - Cin)))

    def fold_pad_weight(w, scale, cin, cout, cinp, coutp):
        # w: (9, cin, cout) with w[ky*3+kx, ci, co] == torch_w[co, ci, ky, kx].
        # Fold the eval-mode BN scale, pad to lane-dense, lay out K-major
        # (matching the im2col tap order), cast to bf16 for the MXU.
        ws = w * scale.reshape(1, 1, cout)
        wp = jnp.zeros((9, cinp, coutp), jnp.float32).at[:, :cin, :cout].set(ws)
        return wp.reshape(9 * cinp, coutp).astype(MXU_DTYPE)

    def pad_bias(b, cout, coutp):
        return jnp.zeros((1, coutp), jnp.float32).at[:, :cout].set(b.reshape(1, cout))

    w1f = fold_pad_weight(w1, s1.reshape(-1), Cin, Cmid, cin_p, cmid_p)
    w2f = fold_pad_weight(w2, s2.reshape(-1), Cmid, Cout, cmid_p, cout_p)
    b1f = pad_bias(b1, Cmid, cmid_p)
    b2f = pad_bias(b2, Cout, cout_p)

    # VMEM budget: double-buffered in/out blocks + weights + bf16 im2col cols
    # + f32 accumulators, with margin; capped at 48 MiB (v7x: 64 MiB per TC).
    itemsize = x.dtype.itemsize
    est = (2 * H * W * cin_p * itemsize                    # input block x2 buffers
           + 2 * H2 * W2 * cout_p * itemsize               # output block x2 buffers
           + 2 * (w1f.size + w2f.size) * 2                 # bf16 weights x2 buffers
           + 2 * (b1f.size + b2f.size) * 4                 # f32 biases x2 buffers
           + 12 * H2 * W2 * (cin_p + cmid_p) * 2           # pooled/padded/col (bf16)
           + 2 * H2 * W2 * (cmid_p + cout_p) * 4)          # f32 matmul accumulators
    vmem_limit = int(min(48 * 1024 * 1024, max(16 * 1024 * 1024, 2 * est)))

    out_packed = pl.pallas_call(
        functools.partial(down_kernel, H2=H2, W2=W2),
        out_shape=jax.ShapeDtypeStruct((N, H2 * W2, cout_p), x_nchw.dtype),
        grid_spec=pltpu.PrefetchScalarGridSpec(
            num_scalar_prefetch=0,
            grid=(N,),
            in_specs=[
                pl.BlockSpec((None, H, W, cin_p), lambda n: (n, 0, 0, 0)),
                pl.BlockSpec((9 * cin_p, cmid_p), lambda n: (0, 0)),
                pl.BlockSpec((1, cmid_p), lambda n: (0, 0)),
                pl.BlockSpec((9 * cmid_p, cout_p), lambda n: (0, 0)),
                pl.BlockSpec((1, cout_p), lambda n: (0, 0)),
            ],
            out_specs=pl.BlockSpec((None, H2 * W2, cout_p), lambda n: (n, 0, 0)),
        ),
        compiler_params=pltpu.CompilerParams(
            dimension_semantics=("parallel",),
            vmem_limit_bytes=vmem_limit,
        ),
    )(x, w1f, b1f, w2f, b2f)

    out_nhwc = out_packed.reshape(N, H2, W2, cout_p)[..., :Cout]   # drop channel pad (free)
    return jnp.transpose(out_nhwc, (0, 3, 1, 2))                   # back to NCHW


# ----------------------------- pure-JAX reference -----------------------------
def ref_down(x, w1, s1, b1, w2, s2, b2):
    xp = jax.lax.reduce_window(x, -jnp.inf, jax.lax.max,
                               (1, 1, 2, 2), (1, 1, 2, 2), "VALID")

    def conv_bn_relu(y, w, scale, bias):
        cin, cout = w.shape[1], w.shape[2]
        y = jax.lax.conv_general_dilated(
            y, w.reshape(3, 3, cin, cout), window_strides=(1, 1), padding="SAME",
            dimension_numbers=("NCHW", "HWIO", "NCHW"))
        y = y * scale.reshape(1, -1, 1, 1) + bias.reshape(1, -1, 1, 1)
        return jnp.maximum(y, 0.0)

    y = conv_bn_relu(xp, w1, s1, b1)
    return conv_bn_relu(y, w2, s2, b2)


def make_params(key, cin, cmid, cout, eps=1e-5):
    ks = jax.random.split(key, 10)
    # conv weights stored as (9, Cin, Cout): w[ky*3+kx, ci, co] == torch_w[co, ci, ky, kx]
    w1 = 0.2 * jax.random.normal(ks[0], (9, cin, cmid), jnp.float32)
    w2 = 0.2 * jax.random.normal(ks[1], (9, cmid, cout), jnp.float32)

    def bn(kg, kb, km, kv, c):
        gamma = 0.5 + jax.random.uniform(kg, (c,), jnp.float32)
        beta = 0.1 * jax.random.normal(kb, (c,), jnp.float32)
        mean = 0.1 * jax.random.normal(km, (c,), jnp.float32)
        var = 0.5 + jax.random.uniform(kv, (c,), jnp.float32)
        scale = gamma / jnp.sqrt(var + eps)
        bias = beta - mean * scale
        return scale.reshape(1, c), bias.reshape(1, c)

    s1, b1 = bn(ks[2], ks[3], ks[4], ks[5], cmid)
    s2, b2 = bn(ks[6], ks[7], ks[8], ks[9], cout)
    return w1, s1, b1, w2, s2, b2


if __name__ == "__main__":
    key = jax.random.PRNGKey(0)
    kx, kp = jax.random.split(key)

    N, Cin, H, W = 2, 4, 16, 16
    Cout = 8  # DoubleConv(in=4, out=8) => mid = out = 8
    x = jax.random.normal(kx, (N, Cin, H, W), jnp.float32)
    w1, s1, b1, w2, s2, b2 = make_params(kp, Cin, Cout, Cout)

    out = down_forward(x, w1, s1, b1, w2, s2, b2)
    out = jax.block_until_ready(out)

    ref = ref_down(x, w1, s1.reshape(-1), b1.reshape(-1), w2, s2.reshape(-1), b2.reshape(-1))
    ref = jax.block_until_ready(ref)

    assert out.shape == (N, Cout, H // 2, W // 2), out.shape
    # bf16 MXU operands (f32 accumulation) vs. a pure-f32 reference: compare
    # at bf16-level tolerance.
    assert jnp.allclose(out, ref, rtol=5e-2, atol=1e-1), float(jnp.max(jnp.abs(out - ref)))
    print("KERNEL_OK")
</pallas_src>

<mosaic_0001>
module attributes {stable_mosaic.version = 11 : i64} {
  func.func @down_kernel(%arg0: i32, %arg1: memref<1x16x16x128xf32, #tpu.memory_space<vmem>>, %arg2: memref<1152x128xbf16, #tpu.memory_space<vmem>>, %arg3: memref<1x128xf32, #tpu.memory_space<vmem>>, %arg4: memref<1152x128xbf16, #tpu.memory_space<vmem>>, %arg5: memref<1x128xf32, #tpu.memory_space<vmem>>, %arg6: memref<1x64x128xf32, #tpu.memory_space<vmem>>) attributes {dimension_semantics = [#tpu.dimension_semantics<parallel>], iteration_bounds = array<i64: 2>, scalar_prefetch = 0 : i64, scratch_operands = 0 : i64, tpu.core_type = #tpu.core_type<tc>, window_params = [{transform_indices = @transform_0, window_bounds = array<i64: 1, 16, 16, 128>}, {pipeline_mode = #tpu.pipeline_mode<synchronous>, transform_indices = @transform_1, window_bounds = array<i64: 1152, 128>}, {pipeline_mode = #tpu.pipeline_mode<synchronous>, transform_indices = @transform_2, window_bounds = array<i64: 1, 128>}, {pipeline_mode = #tpu.pipeline_mode<synchronous>, transform_indices = @transform_3, window_bounds = array<i64: 1152, 128>}, {pipeline_mode = #tpu.pipeline_mode<synchronous>, transform_indices = @transform_4, window_bounds = array<i64: 1, 128>}, {transform_indices = @transform_5, window_bounds = array<i64: 1, 64, 128>}]} {
    %c0 = arith.constant 0 : index
    %c0_0 = arith.constant 0 : index
    %c0_1 = arith.constant 0 : index
    %c0_2 = arith.constant 0 : index
    %0 = vector.load %arg1[%c0, %c0_0, %c0_1, %c0_2] : memref<1x16x16x128xf32, #tpu.memory_space<vmem>>, vector<1x16x16x128xf32>
    %1 = vector.shape_cast %0 : vector<1x16x16x128xf32> to vector<16x16x128xf32>
    %2 = vector.shape_cast %1 : vector<16x16x128xf32> to vector<8x2x16x128xf32>
    %3 = vector.extract_strided_slice %2 {offsets = [0, 0, 0, 0], sizes = [8, 1, 16, 128], strides = [1, 1, 1, 1]} : vector<8x2x16x128xf32> to vector<8x1x16x128xf32>
    %4 = vector.shape_cast %3 : vector<8x1x16x128xf32> to vector<8x16x128xf32>
    %5 = vector.extract_strided_slice %2 {offsets = [0, 1, 0, 0], sizes = [8, 1, 16, 128], strides = [1, 1, 1, 1]} : vector<8x2x16x128xf32> to vector<8x1x16x128xf32>
    %6 = vector.shape_cast %5 : vector<8x1x16x128xf32> to vector<8x16x128xf32>
    %7 = arith.maximumf %4, %6 : vector<8x16x128xf32>
    %8 = vector.shape_cast %7 : vector<8x16x128xf32> to vector<8x8x2x128xf32>
    %9 = vector.extract_strided_slice %8 {offsets = [0, 0, 0, 0], sizes = [8, 8, 1, 128], strides = [1, 1, 1, 1]} : vector<8x8x2x128xf32> to vector<8x8x1x128xf32>
    %10 = vector.shape_cast %9 : vector<8x8x1x128xf32> to vector<8x8x128xf32>
    %11 = vector.extract_strided_slice %8 {offsets = [0, 0, 1, 0], sizes = [8, 8, 1, 128], strides = [1, 1, 1, 1]} : vector<8x8x2x128xf32> to vector<8x8x1x128xf32>
    %12 = vector.shape_cast %11 : vector<8x8x1x128xf32> to vector<8x8x128xf32>
    %13 = arith.maximumf %10, %12 : vector<8x8x128xf32>
    %14 = arith.truncf %13 : vector<8x8x128xf32> to vector<8x8x128xbf16>
    %cst = arith.constant 0.000000e+00 : bf16
    %15 = vector.broadcast %cst : bf16 to vector<1x8x128xbf16>
    %16 = tpu.concatenate %15, %14, %15 in 0 : vector<1x8x128xbf16>, vector<8x8x128xbf16>, vector<1x8x128xbf16> -> vector<10x8x128xbf16>
    %cst_3 = arith.constant 0.000000e+00 : bf16
    %17 = vector.broadcast %cst_3 : bf16 to vector<10x1x128xbf16>
    %18 = tpu.concatenate %17, %16, %17 in 1 : vector<10x1x128xbf16>, vector<10x8x128xbf16>, vector<10x1x128xbf16> -> vector<10x10x128xbf16>
    %19 = vector.extract_strided_slice %18 {offsets = [0, 0, 0], sizes = [8, 8, 128], strides = [1, 1, 1]} : vector<10x10x128xbf16> to vector<8x8x128xbf16>
    %20 = vector.extract_strided_slice %18 {offsets = [0, 1, 0], sizes = [8, 8, 128], strides = [1, 1, 1]} : vector<10x10x128xbf16> to vector<8x8x128xbf16>
    %21 = vector.extract_strided_slice %18 {offsets = [0, 2, 0], sizes = [8, 8, 128], strides = [1, 1, 1]} : vector<10x10x128xbf16> to vector<8x8x128xbf16>
    %22 = vector.extract_strided_slice %18 {offsets = [1, 0, 0], sizes = [8, 8, 128], strides = [1, 1, 1]} : vector<10x10x128xbf16> to vector<8x8x128xbf16>
    %23 = vector.extract_strided_slice %18 {offsets = [1, 1, 0], sizes = [8, 8, 128], strides = [1, 1, 1]} : vector<10x10x128xbf16> to vector<8x8x128xbf16>
    %24 = vector.extract_strided_slice %18 {offsets = [1, 2, 0], sizes = [8, 8, 128], strides = [1, 1, 1]} : vector<10x10x128xbf16> to vector<8x8x128xbf16>
    %25 = vector.extract_strided_slice %18 {offsets = [2, 0, 0], sizes = [8, 8, 128], strides = [1, 1, 1]} : vector<10x10x128xbf16> to vector<8x8x128xbf16>
    %26 = vector.extract_strided_slice %18 {offsets = [2, 1, 0], sizes = [8, 8, 128], strides = [1, 1, 1]} : vector<10x10x128xbf16> to vector<8x8x128xbf16>
    %27 = vector.extract_strided_slice %18 {offsets = [2, 2, 0], sizes = [8, 8, 128], strides = [1, 1, 1]} : vector<10x10x128xbf16> to vector<8x8x128xbf16>
    %28 = tpu.concatenate %19, %20, %21, %22, %23, %24, %25, %26, %27 in 2 : vector<8x8x128xbf16>, vector<8x8x128xbf16>, vector<8x8x128xbf16>, vector<8x8x128xbf16>, vector<8x8x128xbf16>, vector<8x8x128xbf16>, vector<8x8x128xbf16>, vector<8x8x128xbf16>, vector<8x8x128xbf16> -> vector<8x8x1152xbf16>
    %29 = vector.shape_cast %28 : vector<8x8x1152xbf16> to vector<64x1152xbf16>
    %c0_4 = arith.constant 0 : index
    %c0_5 = arith.constant 0 : index
    %30 = vector.load %arg2[%c0_4, %c0_5] : memref<1152x128xbf16, #tpu.memory_space<vmem>>, vector<1152x128xbf16>
    %cst_6 = arith.constant dense<0.000000e+00> : vector<64x128xf32>
    %31 = tpu.matmul %29, %30, %cst_6 {dimension_numbers = #tpu.dot_dimension_numbers<[1], [0], [0], [1], [0, 0, 1, 1], [], []>} : vector<64x1152xbf16>, vector<1152x128xbf16>, vector<64x128xf32> -> vector<64x128xf32>
    %c0_7 = arith.constant 0 : index
    %c0_8 = arith.constant 0 : index
    %32 = vector.load %arg3[%c0_7, %c0_8] : memref<1x128xf32, #tpu.memory_space<vmem>>, vector<1x128xf32>
    %33 = vector.broadcast %32 : vector<1x128xf32> to vector<64x128xf32>
    %34 = arith.addf %31, %33 : vector<64x128xf32>
    %cst_9 = arith.constant 0.000000e+00 : f32
    %35 = vector.broadcast %cst_9 : f32 to vector<64x128xf32>
    %36 = arith.maximumf %34, %35 : vector<64x128xf32>
    %37 = vector.shape_cast %36 : vector<64x128xf32> to vector<8x8x128xf32>
    %38 = arith.truncf %37 : vector<8x8x128xf32> to vector<8x8x128xbf16>
    %cst_10 = arith.constant 0.000000e+00 : bf16
    %39 = vector.broadcast %cst_10 : bf16 to vector<1x8x128xbf16>
    %40 = tpu.concatenate %39, %38, %39 in 0 : vector<1x8x128xbf16>, vector<8x8x128xbf16>, vector<1x8x128xbf16> -> vector<10x8x128xbf16>
    %cst_11 = arith.constant 0.000000e+00 : bf16
    %41 = vector.broadcast %cst_11 : bf16 to vector<10x1x128xbf16>
    %42 = tpu.concatenate %41, %40, %41 in 1 : vector<10x1x128xbf16>, vector<10x8x128xbf16>, vector<10x1x128xbf16> -> vector<10x10x128xbf16>
    %43 = vector.extract_strided_slice %42 {offsets = [0, 0, 0], sizes = [8, 8, 128], strides = [1, 1, 1]} : vector<10x10x128xbf16> to vector<8x8x128xbf16>
    %44 = vector.extract_strided_slice %42 {offsets = [0, 1, 0], sizes = [8, 8, 128], strides = [1, 1, 1]} : vector<10x10x128xbf16> to vector<8x8x128xbf16>
    %45 = vector.extract_strided_slice %42 {offsets = [0, 2, 0], sizes = [8, 8, 128], strides = [1, 1, 1]} : vector<10x10x128xbf16> to vector<8x8x128xbf16>
    %46 = vector.extract_strided_slice %42 {offsets = [1, 0, 0], sizes = [8, 8, 128], strides = [1, 1, 1]} : vector<10x10x128xbf16> to vector<8x8x128xbf16>
    %47 = vector.extract_strided_slice %42 {offsets = [1, 1, 0], sizes = [8, 8, 128], strides = [1, 1, 1]} : vector<10x10x128xbf16> to vector<8x8x128xbf16>
    %48 = vector.extract_strided_slice %42 {offsets = [1, 2, 0], sizes = [8, 8, 128], strides = [1, 1, 1]} : vector<10x10x128xbf16> to vector<8x8x128xbf16>
    %49 = vector.extract_strided_slice %42 {offsets = [2, 0, 0], sizes = [8, 8, 128], strides = [1, 1, 1]} : vector<10x10x128xbf16> to vector<8x8x128xbf16>
    %50 = vector.extract_strided_slice %42 {offsets = [2, 1, 0], sizes = [8, 8, 128], strides = [1, 1, 1]} : vector<10x10x128xbf16> to vector<8x8x128xbf16>
    %51 = vector.extract_strided_slice %42 {offsets = [2, 2, 0], sizes = [8, 8, 128], strides = [1, 1, 1]} : vector<10x10x128xbf16> to vector<8x8x128xbf16>
    %52 = tpu.concatenate %43, %44, %45, %46, %47, %48, %49, %50, %51 in 2 : vector<8x8x128xbf16>, vector<8x8x128xbf16>, vector<8x8x128xbf16>, vector<8x8x128xbf16>, vector<8x8x128xbf16>, vector<8x8x128xbf16>, vector<8x8x128xbf16>, vector<8x8x128xbf16>, vector<8x8x128xbf16> -> vector<8x8x1152xbf16>
    %53 = vector.shape_cast %52 : vector<8x8x1152xbf16> to vector<64x1152xbf16>
    %c0_12 = arith.constant 0 : index
    %c0_13 = arith.constant 0 : index
    %54 = vector.load %arg4[%c0_12, %c0_13] : memref<1152x128xbf16, #tpu.memory_space<vmem>>, vector<1152x128xbf16>
    %cst_14 = arith.constant dense<0.000000e+00> : vector<64x128xf32>
    %55 = tpu.matmul %53, %54, %cst_14 {dimension_numbers = #tpu.dot_dimension_numbers<[1], [0], [0], [1], [0, 0, 1, 1], [], []>} : vector<64x1152xbf16>, vector<1152x128xbf16>, vector<64x128xf32> -> vector<64x128xf32>
    %c0_15 = arith.constant 0 : index
    %c0_16 = arith.constant 0 : index
    %56 = vector.load %arg5[%c0_15, %c0_16] : memref<1x128xf32, #tpu.memory_space<vmem>>, vector<1x128xf32>
    %57 = vector.broadcast %56 : vector<1x128xf32> to vector<64x128xf32>
    %58 = arith.addf %55, %57 : vector<64x128xf32>
    %cst_17 = arith.constant 0.000000e+00 : f32
    %59 = vector.broadcast %cst_17 : f32 to vector<64x128xf32>
    %60 = arith.maximumf %58, %59 : vector<64x128xf32>
    %c0_18 = arith.constant 0 : index
    %c0_19 = arith.constant 0 : index
    %c0_20 = arith.constant 0 : index
    %61 = vector.load %arg6[%c0_18, %c0_19, %c0_20] : memref<1x64x128xf32, #tpu.memory_space<vmem>>, vector<1x64x128xf32>
    %62 = vector.shape_cast %61 : vector<1x64x128xf32> to vector<64x128xf32>
    %63 = vector.shape_cast %60 : vector<64x128xf32> to vector<1x64x128xf32>
    tpu.vector_store %arg6[%c0_18, %c0_19, %c0_20], %63 {strides = array<i32>} : memref<1x64x128xf32, #tpu.memory_space<vmem>>, vector<1x64x128xf32>,
    return
  }
  func.func @transform_0(%arg0: i32) -> (i32, i32, i32, i32) {
    %c0_i32 = arith.constant 0 : i32
    %c0_i32_0 = arith.constant 0 : i32
    %c0_i32_1 = arith.constant 0 : i32
    %c0_i32_2 = arith.constant 0 : i32
    return %arg0, %c0_i32, %c0_i32_0, %c0_i32_1 : i32, i32, i32, i32
  }
  func.func @transform_1(%arg0: i32) -> (i32, i32) {
    %c0_i32 = arith.constant 0 : i32
    %c0_i32_0 = arith.constant 0 : i32
    %c0_i32_1 = arith.constant 0 : i32
    return %c0_i32, %c0_i32_0 : i32, i32
  }
  func.func @transform_2(%arg0: i32) -> (i32, i32) {
    %c0_i32 = arith.constant 0 : i32
    %c0_i32_0 = arith.constant 0 : i32
    %c0_i32_1 = arith.constant 0 : i32
    return %c0_i32, %c0_i32_0 : i32, i32
  }
  func.func @transform_3(%arg0: i32) -> (i32, i32) {
    %c0_i32 = arith.constant 0 : i32
    %c0_i32_0 = arith.constant 0 : i32
    %c0_i32_1 = arith.constant 0 : i32
    return %c0_i32, %c0_i32_0 : i32, i32
  }
  func.func @transform_4(%arg0: i32) -> (i32, i32) {
    %c0_i32 = arith.constant 0 : i32
    %c0_i32_0 = arith.constant 0 : i32
    %c0_i32_1 = arith.constant 0 : i32
    return %c0_i32, %c0_i32_0 : i32, i32
  }
  func.func @transform_5(%arg0: i32) -> (i32, i32, i32) {
    %c0_i32 = arith.constant 0 : i32
    %c0_i32_0 = arith.constant 0 : i32
    %c0_i32_1 = arith.constant 0 : i32
    return %arg0, %c0_i32, %c0_i32_0 : i32, i32, i32
  }
}

</mosaic_0001>

<bundles_post_ra>
// kernel: tpu_custom_call.1
= control target key start
LH: loop header
LB: loop body
LE: loop exit
PB: predicated region body
PF: predicated region fallthrough
CT: control target
= control target key end

     0   :  { %10 = vsyncpa [#allocation3], 0  ;;  %s5585_s0 = inlined_call_operand.hbm [shape: f32[2,16,16,128], index: 0, kind: input, shape index: {}]   ;;  %s5586_s1 = inlined_call_operand.hbm [shape: bf16[1152,128], index: 1, kind: input, shape index: {}]   ;;  %s5587_s2 = inlined_call_operand.vmem [shape: f32[1,128], index: 2, kind: input, shape index: {}]   ;;  %s5588_s3 = inlined_call_operand.hbm [shape: bf16[1152,128], index: 3, kind: input, shape index: {}]   ;;  %s5589_s4 = inlined_call_operand.vmem [shape: f32[1,128], index: 4, kind: input, shape index: {}]   ;;  %s5590_s5 = inlined_call_operand.hbm [shape: f32[2,64,128], index: 5, kind: output, shape index: {}]  }
   0x1   :  { %12 = vsyncpa [#allocation3 + $0x1], 0 }
   0x2   :  { %13 = vsyncpa [#allocation6], 0 }
   0x3   :  { %14 = vsyncpa [#allocation4], 0 }
   0x4   :  { %16 = vsyncpa [#allocation4 + $0x1], 0  ;;  %s4777_s18 = smov 0   ;;  %s4779_s19 = smov 0  }
   0x5   :  { %s4781_s20 = smov 0   ;;  %s4783_s21 = smov 0  }
   0x6 LB: > { %s4798_s22 = sadd.s32 4294967295, %s4733_s21   ;;  %s3690_s23 = sadd.s32 4294967294, %s4733_s21   ;;  %s4733_s21 = sphi %s4783_s21, %s5659_s21   ;;  %s4729_s20 = sphi %s4781_s20, %s5658_s20   ;;  %s4725_s19 = sphi %s4779_s19, %s5657_s19   ;;  %s4721_s18 = sphi %s4777_s18, %s5656_s18  }
   0x7   : > { %p42_p0 = scmp.ne.s32.totalorder %s4725_s19, %s4721_s18  ;;  %p5591_p1 = scmp.eq.s32.totalorder %s4798_s22, 0 }
   0x8   : > { %p156_p3 = scmp.eq.s32.totalorder %s3690_s23, 1  ;;  %p3691_p5 = scmp.ge.s32.totalorder %s4733_s21, 1 }
   0x9   : > { %p4807_p4 = por %p5591_p1, %p42_p0  ;;  %p163_p7 = scmp.lt.s32.totalorder %s4733_s21, 3 }
   0xa   : > { %p4812_p6 = por %p156_p3, %p42_p0  ;;  %s4735_s27 = smov [#allocation5]  }
   0xb   : > { %s5607_s24 = scalar_select %p4807_p4, 1, 0 }
   0xc   : > { %s5608_s25 = scalar_select %p4812_p6, 1, 0 }
   0xd   : > { %p4817_p8 = pnand %p3691_p5, %p163_p7  ;;  %s175_s28 = sshll.u32 %s4735_s27, 4  ;;  %s176_s28 = int_to_ptr.vmem [resolvable:$true] %s175_s28 }
   0xe   : > { %s4736_s30 = smov [#allocation7]   ;;  %s4596_s7 = scalar_lea.vmem %s176_s28, 9216 }
   0xf   : > { %s5609_s26 = scalar_select %p4817_p8, 1, 0 }
  0x10   : > { %p4378_p9 = pneg %p4817_p8  ;;  %s191_s6 = sshll.u32 %s4736_s30, 4  ;;  %s192_s6 = int_to_ptr.vmem [resolvable:$true] %s191_s6 }
  0x11   : > { %p4597_p13 = scmp.ne.s32.totalorder %s176_s28, %s4596_s7  ;;  %p4604_p5 = scmp.lt.s32.totalorder %s176_s28, %s176_s28 }
  0x12   : > { %p4826_p11 = pnand %p4378_p9, %p5591_p1  ;;  %p4605_p7 = scmp.lt.s32.totalorder %s4596_s7, %s4596_s7 }
  0x14   : > { %p4587_p12 = pneg %p4826_p11  ;;  %p4606_p10 = por %p4605_p7, %p4604_p5 }
  0x16   : > { %p4599_p0 = pnand %p4597_p13, %p4587_p12 }
  0x18   : > { %p4600_p3 = pneg %p4599_p0 }
  0x1a   : > { %p4607_p9 = pnand %p4606_p10, %p4600_p3 }
  0x1c   : > { %4610 = shalt.err (!%p4607_p9)
}
  0x1d   : > { %s4737_s8 = smov 64   ;;  %s4738_s9 = smov 4  }
  0x1e   : > { %4381 = dma.hbm_to_vmem [thread:$0]  (!%p4826_p11), %s5586_s1, 9216, %s176_s28, [#allocation6], %s4737_s8, %s4737_s8, %s4738_s9  }
  0x1f   : > { %s4622_s12 = scalar_lea.vmem %s192_s6, 9216  ;;  %p4630_p2 = scmp.lt.s32.totalorder %s192_s6, %s192_s6 }
  0x20   : > { %p4623_p1 = scmp.ne.s32.totalorder %s192_s6, %s4622_s12  ;;  %p4631_p6 = scmp.lt.s32.totalorder %s4622_s12, %s4622_s12 }
  0x22   : > { %p4625_p13 = pnand %p4623_p1, %p4587_p12  ;;  %p4632_p5 = por %p4631_p6, %p4630_p2 }
  0x24   : > { %p4626_p0 = pneg %p4625_p13 }
  0x26   : > { %p4633_p10 = pnand %p4632_p5, %p4626_p0 }
  0x28   : > { %4636 = shalt.err (!%p4633_p10)
}
  0x29   : > { %4384 = dma.hbm_to_vmem [thread:$0]  (!%p4826_p11), %s5588_s3, 9216, %s192_s6, [#allocation6], %s4737_s8, %s4737_s8, %s4738_s9  }
  0x2a   : > { %s4849_s15 = sadd.s32 1, %s4733_s21   ;;  %s29_s16 = sadd.s32 1, %s4729_s20 }
  0x2b   : > { %s26_s17 = ssub.s32 %s4733_s21, %s4849_s15  ;;  %p36_p1 = scmp.ne.s32.totalorder %s4729_s20, %s4725_s19 }
  0x2c   : > { %p27_p2 = scmp.eq.s32.totalorder %s26_s17, 0  ;;  %p37_p6 = scmp.eq.s32.totalorder %s4733_s21, 0 }
  0x2d   : > { %p5611_p12 = scmp.eq.s32.totalorder %s4798_s22, 1  ;;  %p4395_p7 = scmp.lt.s32.totalorder %s4733_s21, 2 }
  0x2e   : > { %s4865_s27 = scalar_select %p27_p2, %s4729_s20, %s29_s16  }
  0x2f   : > { %p4859_p3 = por %p5611_p12, %p36_p1  ;;  %p38_p9 = por %p37_p6, %p36_p1 }
  0x30   : > { %s208_s28 = sand.u32 1, %s4729_s20   ;;  %s3972_s30 = sshll.u32 %s4733_s21, 12 }
  0x31   : > { %s5612_s23 = scalar_select %p4859_p3, 1, 0 }
  0x32   : > { %s3695_s29 = sshll.u32 %s208_s28, 8  ;;  %s4872_s8 = scalar_lea.hbm %s5585_s0, %s3972_s30 }
  0x33   : > { %s212_s9 = scalar_lea.vmem [#allocation2], %s3695_s29  ;;  %p4876_p11 = pnand %p4395_p7, %p38_p9 }
  0x34   : > { %s219_s10 = sshll.u32 %s212_s9, 4  ;;  %s4880_s12 = scalar_lea.sflag [#allocation3], %s208_s28  ;;  %s4874_s10 = int_to_ptr.vmem [resolvable:$true] %s219_s10 }
  0x35   : > { %s4637_s13 = scalar_lea.hbm %s4872_s8, 4096  ;;  %p4639_p0 = pneg %p4876_p11 }
  0x36   : > { %p4638_p13 = scmp.ne.s32.totalorder %s4872_s8, %s4637_s13  ;;  %s4642_s17 = scalar_lea.hbm %s5585_s0, 8192 }
  0x37   : > { %p4643_p1 = scmp.lt.s32.totalorder %s4872_s8, %s5585_s0  ;;  %p4644_p2 = scmp.lt.s32.totalorder %s4642_s17, %s4637_s13 }
  0x38   : > { %p4640_p5 = pnand %p4639_p0, %p4638_p13 }
  0x39   : > { %p4645_p6 = por %p4644_p2, %p4643_p1 }
  0x3a   : > { %p4641_p10 = pneg %p4640_p5 }
  0x3c   : > { %p4646_p12 = pnand %p4645_p6, %p4641_p10 }
  0x3e   : > { %4649 = shalt.err (!%p4646_p12)
}
  0x3f   : > { %s4650_s28 = scalar_lea.vmem %s4874_s10, 4096  ;;  %s4739_s6 = smov [#allocation2]  }
  0x40   : > { %p4651_p7 = scmp.ne.s32.totalorder %s4874_s10, %s4650_s28  ;;  %s4655_s7 = sshll.u32 %s4739_s6, 4  ;;  %s4656_s7 = int_to_ptr.vmem [resolvable:$false] %s4655_s7 }
  0x41   : > { %s4657_s9 = scalar_lea.vmem %s4656_s7, 8192  ;;  %p4658_p5 = scmp.lt.s32.totalorder %s4874_s10, %s4656_s7 }
  0x42   : > { %p4653_p9 = pnand %p4651_p7, %p4639_p0  ;;  %p4659_p3 = scmp.lt.s32.totalorder %s4657_s9, %s4650_s28 }
  0x44   : > { %p4654_p13 = pneg %p4653_p9  ;;  %p4660_p4 = por %p4659_p3, %p4658_p5 }
  0x46   : > { %p4661_p8 = pnand %p4660_p4, %p4654_p13 }
  0x48   : > { %4664 = shalt.err (!%p4661_p8)
}
  0x49   : > { %s4740_s13 = smov 128   ;;  %s4741_s14 = smov 8  }
  0x4a   : > { %4388 = dma.hbm_to_vmem [thread:$0]  (!%p4876_p11), %s4872_s8, 4096, %s4874_s10, %s4880_s12, %s4740_s13, %s4740_s13, %s4741_s14  }
  0x4b   : > { %p5614_p0 = scmp.ne.s32.totalorder %s5609_s26, 0 }
  0x4d   : > { %231 = sbr.rel (%p5614_p0) target bundleno = 800 (0x320), region = 40 }
  0x52   : > { %s4904_s16 = sand.u32 1, %s4725_s19   ;;  %p5615_p4 = scmp.ne.s32.totalorder %s5607_s24, 0 }
  0x53   : > { %s3699_s17 = sshll.u32 %s4904_s16, 8  ;;  %s234_s29 = scalar_lea.sflag [#allocation3], %s4904_s16 }
  0x54   : > { %s4908_s30 = scalar_lea.vmem [#allocation2], %s3699_s17 }
  0x55   : > { %4708 = dma.done.wait (%p5615_p4), %s234_s29, 4096  }
  0x56   : > { %4710 = vsyncadd (%p5615_p4), %s234_s29, 4294963200  ;;  %p5616_p8 = scmp.eq.s32.totalorder %s4798_s22, 0 }
  0x58   : > { %4712 = dma.done.wait (%p5616_p8), [#allocation6], 18432   ;;  %p5617_p3 = pmov %p5616_p8 }
  0x59   : > { %vm1321_vm0 = vsmask.f32 256  ;;  %v4441_v0 = vld [vmem:[#allocation5 + $0x78] sm:$0xff]   ;;  %vm1333_vm1 = vsmask.f32 4352  ;;  %v4444_v3 = vld [vmem:[#allocation5 + $0x70] sm:$0xff]   ;;  %v341_v30 = vlaneseq }
  0x5a   : > { %4714 = vsyncadd (%p5617_p3), [#allocation6], 4294948864  ;;  %v4442_v1 = vld [vmem:[#allocation5 + $0x38] sm:$0xff]   ;;  %3974 = vmatprep.subr.bf16.mxu0 %v4441_v0  ;;  %v4446_v5 = vld [vmem:[#allocation5 + $0x30] sm:$0xff]   ;;  %vm1320_vm2 = vcmask 1040384   ;;  %v5618_v11 = vmov 0 }
  0x5b   : > { %v4443_v2 = vld [vmem:[#allocation5 + $0xf8] sm:$0xff]   ;;  %3975 = vmatpush3.bf16.msra.mxu0 %v4442_v1  ;;  %v4447_v6 = vld [vmem:[#allocation5 + $0xf0] sm:$0xff]   ;;  %v4448_v7 = vld [vmem:[#allocation5 + $0x68] sm:$0xff]   ;;  %vm1332_vm4 = vcmask 1044480   ;;  %v5621_v15 = vmov 0  ;;  %v4742_v20 = vmov 0  }
  0x5c   : > { %4014 = vmatprep.subr.bf16.mxu1 %v4443_v2  ;;  %v4445_v4 = vld [vmem:[#allocation5 + $0xb8] sm:$0xff]   ;;  %3976 = vmatprep.subr.bf16.mxu0 %v4444_v3  ;;  %v4449_v8 = vld [vmem:[#allocation5 + $0xb0] sm:$0xff]   ;;  %v4450_v9 = vld [vmem:[#allocation5 + $0x28] sm:$0xff]   ;;  %v1251_v21 = vrot.slane %v4742_v20, 7  ;;  %v4743_v28 = vmov 1983009808  }
  0x5d   : > { %4015 = vmatpush3.bf16.msra.mxu1 %v4445_v4  ;;  %v4451_v10 = vld [vmem:[#allocation5 + $0xe8] sm:$0xff]   ;;  %vm4919_vm3 = vmand %vm1320_vm2, %vm1321_vm0  ;;  %v4452_v12 = vld [vmem:[#allocation5 + $0x60] sm:$0xff]   ;;  %v339_v29 = vunpack.c.l.s4 %v4743_v28  ;;  %v342_v37 = vshrl.u32 %v341_v30, 7  ;;  %vm1122_vm6 = vcmask 1041409   ;;  %vm1125_vm7 = vcmask 1042434   ;;  %s3702_s11 = sshll.u32 %s4904_s16, 6 }
  0x5e   : > { %4016 = vmatprep.subr.bf16.mxu1 %v4447_v6  ;;  %v5619_v11 = vsel %vm4919_vm3, 4294967295, %v5618_v11  ;;  %v4453_v13 = vld [vmem:[#allocation5 + $0xa8] sm:$0xff]   ;;  %v4454_v14 = vld [vmem:[#allocation5 + $0x20] sm:$0xff]   ;;  %vm4924_vm5 = vmand %vm1332_vm4, %vm1333_vm1  ;;  %v1323_v26 = vsel %vm4919_vm3, 0, %v1251_v21  ;;  %vm1128_vm8 = vcmask 1043459   ;;  %vm1131_vm9 = vcmask 1044484  }
  0x5f   : > { %3977 = vmatpush3.bf16.msra.mxu0 %v4446_v5  ;;  %5620 = vst [vmem:[#allocation12_spill] sm:$0xff] %v5619_v11  ;;  %v5622_v15 = vsel %vm4924_vm5, 4294967295, %v5621_v15  ;;  %v4455_v16 = vld [vmem:[#allocation5 + $0xe0] sm:$0xff]   ;;  %v4456_v17 = vld [vmem:[#allocation5 + $0x58] sm:$0xff]   ;;  %v4460_v23 = vld [vmem:[#allocation5 + $0x50] sm:$0xff]   ;;  %v4932_v33 = vsel %vm4924_vm5, %v1323_v26, 0  ;;  %v340_v36 = vunpack.c.0.s8 %v339_v29 }
  0x60   : > { %3978 = vmatprep.subr.bf16.mxu0 %v4448_v7  ;;  %5623 = vst [vmem:[#allocation13_spill] sm:$0xff] %v5622_v15  ;;  %v4457_v18 = vld [vmem:[#allocation5 + $0xa0] sm:$0xff]   ;;  %v4458_v19 = vld [vmem:[#allocation5 + $0x18] sm:$0xff]   ;;  %v4462_v25 = vld [vmem:[#allocation5 + $0x10] sm:$0xff]   ;;  %v1347_v39 = vshll.u32 %v4932_v33, 16  ;;  %v1345_v47 = vshrl.u32 %v4932_v33, 16 }
  0x61   : > { %4017 = vmatpush3.bf16.msra.mxu1 %v4449_v8  ;;  %v4459_v22 = vld [vmem:[#allocation5 + $0xd8] sm:$0xff]   ;;  %v4463_v27 = vld [vmem:[#allocation5 + $0xd0] sm:$0xff]   ;;  %v4464_v31 = vld [vmem:[#allocation5 + $0x48] sm:$0xff]   ;;  %5624 = vst [vmem:[#allocation14_spill] sm:$0xff] %v4932_v33  ;;  %v4935_v43 = vsub.s32 %v340_v36, %v342_v37  ;;  %v4951_v1 = vrot.slane %v4932_v33, 1  ;;  %vm1134_vm10 = vcmask 1045509  }
  0x62   : > { %4018 = vmatprep.subr.bf16.mxu1 %v4451_v10  ;;  %v4461_v24 = vld [vmem:[#allocation5 + $0x98] sm:$0xff]   ;;  %v4465_v32 = vld [vmem:[#allocation5 + $0x90] sm:$0xff]   ;;  %v4466_v34 = vld [vmem:[#allocation5 + $0x8] sm:$0xff]   ;;  %v1349_v48 = vrot.slane %v1347_v39, 1  ;;  %vm1137_vm11 = vcmask 1046534   ;;  %vm1140_vm12 = vcmask 1047559  }
  0x63   : > { %3979 = vmatpush3.bf16.msra.mxu0 %v4450_v9  ;;  %v4467_v35 = vld [vmem:[#allocation5 + $0xc8] sm:$0xff]   ;;  %v4468_v38 = vld [vmem:[#allocation5 + $0x40] sm:$0xff]   ;;  %v275_v46 = vld [vmem:[%s4908_s30 + $0x10] sm:$0xff]  ;;  %5626 = vst [vmem:[#allocation16_spill] sm:$0xff] %v4951_v1  ;;  %s5521_s12 = scalar_lea.vmem [#allocation8], %s3702_s11  ;;  %s3973_s6 = sshll.u32 %s4798_s22, 10 }
  0x64   : > { %3980 = vmatprep.subr.bf16.mxu0 %v4452_v12  ;;  %v4469_v40 = vld [vmem:[#allocation5 + $0x88] sm:$0xff]   ;;  %v4470_v41 = vld [vmem:[#allocation5] sm:$0xff]   ;;  %v276_v49 = vld [vmem:[%s4908_s30 + $0x18] sm:$0xff]  ;;  %v4948_v63 = vor.u32 %v1349_v48, %v1345_v47  ;;  %s3598_s28 = sshll.u32 %s5521_s12, 4  ;;  %s5540_s13 = scalar_lea.hbm %s5590_s5, %s3973_s6  ;;  %s5534_s28 = int_to_ptr.vmem [resolvable:$true] %s3598_s28 }
  0x65   : > { %4019 = vmatpush3.bf16.msra.mxu1 %v4453_v13  ;;  %v4471_v42 = vld [vmem:[#allocation5 + $0xc0] sm:$0xff]   ;;  %v274_v45 = vld [vmem:[%s4908_s30 + $0x8] sm:$0xff]  ;;  %v279_v53 = vld [vmem:[%s4908_s30 + $0x30] sm:$0xff]  ;;  %s3585_s14 = scalar_lea.sflag [#allocation4], %s4904_s16  ;;  %s4665_s17 = scalar_lea.vmem %s5534_s28, 1024 }
  0x66   : > { %4020 = vmatprep.subr.bf16.mxu1 %v4455_v16  ;;  %v273_v44 = vld [vmem:[%s4908_s30] sm:$0xff]  ;;  %v278_v51 = vld [vmem:[%s4908_s30 + $0x28] sm:$0xff]  ;;  %v280_v54 = vld [vmem:[%s4908_s30 + $0x38] sm:$0xff]  ;;  %v306_v55 = vmax.f32 %v274_v45, %v276_v49  ;;  %5625 = vst [vmem:[#allocation15_spill] sm:$0xff] %v4948_v63  ;;  %p4666_p11 = scmp.ne.s32.totalorder %s5534_s28, %s4665_s17  ;;  %p5653_p10 = scmp.ne.s32.totalorder %s5612_s23, 0 }
  0x67   : > { %3981 = vmatpush3.bf16.msra.mxu0 %v4454_v14  ;;  %v277_v50 = vld [vmem:[%s4908_s30 + $0x20] sm:$0xff]  ;;  %v305_v52 = vmax.f32 %v273_v44, %v275_v46  ;;  %v308_v57 = vmax.f32 %v278_v51, %v280_v54  ;;  %v4473_v0 = vld [vmem:[#allocation5 + $0x178] sm:$0xff]   ;;  %s4744_s22 = smov [#allocation8]  }
  0x68   : > { %3982 = vmatprep.subr.bf16.mxu0 %v4456_v17  ;;  %v307_v56 = vmax.f32 %v277_v50, %v279_v53  ;;  %v4472_v60 = vld [vmem:[#allocation5 + $0x80] sm:$0xff]   ;;  %v354_v61 = vcombine.high %v306_v55, %v306_v55  ;;  %v361_v62 = vrot.slane %v306_v55, %v4935_v43  ;;  %v4475_v10 = vld [vmem:[#allocation5 + $0x1f8] sm:$0xff]   ;;  %p4667_p1 = pnand %p4666_p11, %p5653_p10  ;;  %s4669_s29 = sshll.u32 %s4744_s22, 4  ;;  %s4670_s29 = int_to_ptr.vmem [resolvable:$false] %s4669_s29 }
  0x69   : > { %4021 = vmatpush3.bf16.msra.mxu1 %v4457_v18  ;;  %v337_v58 = vcombine.high %v305_v52, %v305_v52  ;;  %v344_v59 = vrot.slane %v305_v52, %v4935_v43  ;;  %v388_v8 = vcombine.high %v308_v57, %v308_v57  ;;  %v395_v9 = vrot.slane %v308_v57, %v4935_v43  ;;  %p4672_p6 = scmp.lt.s32.totalorder %s5534_s28, %s4670_s29 }
  0x6a   : > { %4022 = vmatprep.subr.bf16.mxu1 %v4459_v22  ;;  %v371_v4 = vcombine.high %v307_v56, %v307_v56  ;;  %v378_v5 = vrot.slane %v307_v56, %v4935_v43  ;;  %v368_v6 = vrot.slane %v354_v61, %v4935_v43  ;;  %v369_v7 = vcombine.high %v361_v62, %v361_v62  ;;  %p4668_p2 = pneg %p4667_p1 }
  0x6b   : > { %3983 = vmatpush3.bf16.msra.mxu0 %v4458_v19  ;;  %v351_v2 = vrot.slane %v337_v58, %v4935_v43  ;;  %v352_v3 = vcombine.high %v344_v59, %v344_v59  ;;  %v3703_v16 = vrot.slane %v344_v59, 9  ;;  %v402_v18 = vrot.slane %v388_v8, %v4935_v43 }
  0x6c   : > { %3984 = vmatprep.subr.bf16.mxu0 %v4460_v23  ;;  %v385_v13 = vrot.slane %v371_v4, %v4935_v43  ;;  %v386_v14 = vcombine.high %v378_v5, %v378_v5  ;;  %v370_v17 = vcombine.high %v368_v6, %v368_v6  ;;  %v403_v19 = vcombine.high %v395_v9, %v395_v9 }
  0x6d   : > { %4023 = vmatpush3.bf16.msra.mxu1 %v4461_v24  ;;  %v353_v12 = vcombine.high %v351_v2, %v351_v2  ;;  %v3704_v20 = vrot.slane %v352_v3, 9  ;;  %v3705_v22 = vrot.slane %v351_v2, 9  ;;  %v3707_v24 = vrot.slane %v361_v62, 9 }
  0x6e   : > { %4024 = vmatprep.subr.bf16.mxu1 %v4463_v27  ;;  %v387_v21 = vcombine.high %v385_v13, %v385_v13  ;;  %v3708_v26 = vrot.slane %v369_v7, 9  ;;  %v3709_v27 = vrot.slane %v368_v6, 9  ;;  %v3710_v28 = vrot.slane %v370_v17, 9 }
  0x6f   : > { %3985 = vmatpush3.bf16.msra.mxu0 %v4462_v25  ;;  %v3706_v23 = vrot.slane %v353_v12, 9  ;;  %v404_v25 = vcombine.high %v402_v18, %v402_v18  ;;  %v3711_v29 = vrot.slane %v378_v5, 9  ;;  %v3712_v30 = vrot.slane %v386_v14, 9 }
  0x70   : > { %3986 = vmatprep.subr.bf16.mxu0 %v4464_v31  ;;  %v3713_v31 = vrot.slane %v385_v13, 9  ;;  %v3717_v36 = vrot.slane %v402_v18, 9  ;;  %v866_v39 = vmax.f32 %v352_v3, %v3704_v20  ;;  %v870_v44 = vmax.f32 %v369_v7, %v3708_v26 }
  0x71   : > { %4025 = vmatpush3.bf16.msra.mxu1 %v4465_v32  ;;  %v3714_v32 = vrot.slane %v387_v21, 9  ;;  %v3718_v37 = vrot.slane %v404_v25, 9  ;;  %v871_v45 = vmax.f32 %v368_v6, %v3709_v27  ;;  %v872_v46 = vmax.f32 %v370_v17, %v3710_v28  ;;  %v281_v27 = vld [vmem:[%s4908_s30 + $0x40] sm:$0xff]  ;;  %v283_v28 = vld [vmem:[%s4908_s30 + $0x50] sm:$0xff] }
  0x72   : > { %4026 = vmatprep.subr.bf16.mxu1 %v4467_v35  ;;  %v3716_v35 = vrot.slane %v403_v19, 9  ;;  %v873_v47 = vmax.f32 %v378_v5, %v3711_v29  ;;  %v874_v48 = vmax.f32 %v386_v14, %v3712_v30  ;;  %v875_v49 = vmax.f32 %v385_v13, %v3713_v31 }
  0x73   : > { %3987 = vmatpush3.bf16.msra.mxu0 %v4466_v34  ;;  %v3715_v34 = vrot.slane %v395_v9, 9  ;;  %v876_v50 = vmax.f32 %v387_v21, %v3714_v32  ;;  %v879_v53 = vmax.f32 %v402_v18, %v3717_v36  ;;  %v880_v54 = vmax.f32 %v404_v25, %v3718_v37  ;;  %v285_v36 = vld [vmem:[%s4908_s30 + $0x60] sm:$0xff] }
  0x74   : > { %3988 = vmatprep.subr.bf16.mxu0 %v4468_v38  ;;  %v865_v38 = vmax.f32 %v344_v59, %v3703_v16  ;;  %v878_v52 = vmax.f32 %v403_v19, %v3716_v35  ;;  %v930_v56 = vpack.c.bf16 %v866_v39, %v866_v39  ;;  %v935_v61 = vpack.c.bf16 %v871_v45, %v871_v45  ;;  %v284_v35 = vld [vmem:[%s4908_s30 + $0x58] sm:$0xff] }
  0x75   : > { %4027 = vmatpush3.bf16.msra.mxu1 %v4469_v40  ;;  %v867_v40 = vmax.f32 %v351_v2, %v3705_v22  ;;  %v877_v51 = vmax.f32 %v395_v9, %v3715_v34  ;;  %v938_v2 = vpack.c.bf16 %v874_v48, %v874_v48  ;;  %v939_v3 = vpack.c.bf16 %v875_v49, %v875_v49  ;;  %v282_v34 = vld [vmem:[%s4908_s30 + $0x48] sm:$0xff] }
  0x76   : > { %4028 = vmatprep.subr.bf16.mxu1 %v4471_v42  ;;  %v869_v42 = vmax.f32 %v361_v62, %v3707_v24  ;;  %v929_v55 = vpack.c.bf16 %v865_v38, %v865_v38  ;;  %v936_v62 = vpack.c.bf16 %v872_v46, %v872_v46  ;;  %v940_v4 = vpack.c.bf16 %v876_v50, %v876_v50  ;;  %v287_v46 = vld [vmem:[%s4908_s30 + $0x70] sm:$0xff] }
  0x77   : > { %3989 = vmatpush3.bf16.msra.mxu0 %v4470_v41  ;;  %v868_v41 = vmax.f32 %v353_v12, %v3706_v23  ;;  %v931_v57 = vpack.c.bf16 %v867_v40, %v867_v40  ;;  %v941_v5 = vpack.c.bf16 %v877_v51, %v877_v51  ;;  %v942_v6 = vpack.c.bf16 %v878_v52, %v878_v52 }
  0x78   : > { %4054 = vmatprep.subr.bf16.mxu0 %v4473_v0  ;;  %v933_v59 = vpack.c.bf16 %v869_v42, %v869_v42  ;;  %v937_v0 = vpack.c.bf16 %v873_v47, %v873_v47  ;;  %v943_v7 = vpack.c.bf16 %v879_v53, %v879_v53  ;;  %v944_v8 = vpack.c.bf16 %v880_v54, %v880_v54 }
  0x79   : > { %4029 = vmatpush3.bf16.msra.mxu1 %v4472_v60  ;;  %v932_v58 = vpack.c.bf16 %v868_v41, %v868_v41  ;;  %v934_v60 = vpack.c.bf16 %v870_v44, %v870_v44  ;;  %v1057_v9 = vunpack.c.l.b16 %v929_v55  ;;  %v1059_v12 = vunpack.c.l.b16 %v931_v57 }
  0x7a   : > { %4094 = vmatprep.subr.bf16.mxu1 %v4475_v10  ;;  %v1058_v10 = vunpack.c.l.b16 %v930_v56  ;;  %v1061_v14 = vunpack.c.l.b16 %v933_v59  ;;  %v1063_v17 = vunpack.c.l.b16 %v935_v61  ;;  %v1064_v18 = vunpack.c.l.b16 %v936_v62 }
  0x7b   : > { %v1060_v13 = vunpack.c.l.b16 %v932_v58  ;;  %v1062_v16 = vunpack.c.l.b16 %v934_v60  ;;  %v1065_v19 = vunpack.c.l.b16 %v937_v0  ;;  %v1066_v20 = vunpack.c.l.b16 %v938_v2 }
  0x7c   : > { %v1067_v21 = vunpack.c.l.b16 %v939_v3  ;;  %v1068_v22 = vunpack.c.l.b16 %v940_v4  ;;  %v1069_v23 = vunpack.c.l.b16 %v941_v5  ;;  %v1070_v24 = vunpack.c.l.b16 %v942_v6 }
  0x7d   : > { %v1071_v25 = vunpack.c.l.b16 %v943_v7  ;;  %v1072_v26 = vunpack.c.l.b16 %v944_v8  ;;  %v1121_v29 = vrot.slane %v1058_v10, 7  ;;  %v1124_v30 = vrot.slane %v1059_v12, 6 }
  0x7e   : > { %v1127_v31 = vrot.slane %v1060_v13, 5  ;;  %v1130_v32 = vrot.slane %v1061_v14, 4  ;;  %v1133_v37 = vrot.slane %v1062_v16, 3  ;;  %v1136_v38 = vrot.slane %v1063_v17, 2 }
  0x7f   : > { %v1139_v39 = vrot.slane %v1064_v18, 1  ;;  %v1142_v40 = vrot.slane %v1066_v20, 7  ;;  %v1123_v41 = vsel %vm1122_vm6, %v1121_v29, %v1057_v9  ;;  %v1144_v42 = vrot.slane %v1067_v21, 6 }
  0x80   : > { %v1146_v44 = vrot.slane %v1068_v22, 5  ;;  %v1148_v45 = vrot.slane %v1069_v23, 4  ;;  %v1126_v47 = vsel %vm1125_vm7, %v1124_v30, %v1123_v41  ;;  %v1150_v49 = vrot.slane %v1070_v24, 3 }
  0x81   : > { %v1143_v48 = vsel %vm1122_vm6, %v1142_v40, %v1065_v19  ;;  %v1152_v50 = vrot.slane %v1071_v25, 2  ;;  %v1129_v51 = vsel %vm1128_vm8, %v1127_v31, %v1126_v47  ;;  %v1154_v53 = vrot.slane %v1072_v26, 1 }
  0x82   : > { %v1145_v52 = vsel %vm1125_vm7, %v1144_v42, %v1143_v48  ;;  %v309_v54 = vmax.f32 %v281_v27, %v283_v28  ;;  %v1132_v55 = vsel %vm1131_vm9, %v1130_v32, %v1129_v51  ;;  %v310_v57 = vmax.f32 %v282_v34, %v284_v35 }
  0x83   : > { %v1147_v56 = vsel %vm1128_vm8, %v1146_v44, %v1145_v52  ;;  %v4972_v58 = vmax.f32 %v285_v36, %v287_v46  ;;  %v1135_v59 = vsel %vm1134_vm10, %v1133_v37, %v1132_v55 }
  0x84   : > { %v1149_v60 = vsel %vm1131_vm9, %v1148_v45, %v1147_v56  ;;  %v405_v61 = vcombine.high %v309_v54, %v309_v54  ;;  %v412_v62 = vrot.slane %v309_v54, %v4935_v43  ;;  %v1138_v0 = vsel %vm1137_vm11, %v1136_v38, %v1135_v59 }
  0x85   : > { %v1151_v2 = vsel %vm1134_vm10, %v1150_v49, %v1149_v60  ;;  %v422_v3 = vcombine.high %v310_v57, %v310_v57  ;;  %v429_v4 = vrot.slane %v310_v57, %v4935_v43  ;;  %v1141_v5 = vsel %vm1140_vm12, %v1139_v39, %v1138_v0 }
  0x86   : > { %v1153_v6 = vsel %vm1137_vm11, %v1152_v50, %v1151_v2  ;;  %v419_v7 = vrot.slane %v405_v61, %v4935_v43  ;;  %v420_v8 = vcombine.high %v412_v62, %v412_v62  ;;  %v1240_v10 = vpack.c.b16 %v1141_v5, %v1141_v5  ;;  %v4479_v2 = vld [vmem:[#allocation5 + $0x1f0] sm:$0xff]  }
  0x87   : > { %v1155_v9 = vsel %vm1140_vm12, %v1154_v53, %v1153_v6  ;;  %v436_v12 = vrot.slane %v422_v3, %v4935_v43  ;;  %v437_v13 = vcombine.high %v429_v4, %v429_v4  ;;  %v3719_v17 = vrot.slane %v412_v62, 9 }
  0x88   : > { %v1241_v14 = vpack.c.b16 %v1155_v9, %v1155_v9  ;;  %v421_v16 = vcombine.high %v419_v7, %v419_v7  ;;  %v3720_v18 = vrot.slane %v420_v8, 9  ;;  %v1256_v19 = vshrl.u32 %v1240_v10, 16 }
  0x89   : > { %v1259_v20 = vshll.u32 %v1240_v10, 16  ;;  %v438_v21 = vcombine.high %v436_v12, %v436_v12  ;;  %v3721_v22 = vrot.slane %v419_v7, 9  ;;  %v3723_v26 = vrot.slane %v429_v4, 9  ;;  %v286_v10 = vld [vmem:[%s4908_s30 + $0x68] sm:$0xff] }
  0x8a   : > { %v1263_v23 = vshrl.u32 %v1241_v14, 16  ;;  %v1266_v24 = vshll.u32 %v1241_v14, 16  ;;  %v3722_v25 = vrot.slane %v421_v16, 9  ;;  %v1258_v27 = vrot.slane %v1256_v19, 7  ;;  %v4474_v14 = vld [vmem:[#allocation5 + $0x138] sm:$0xff]   ;;  %v4481_v19 = vld [vmem:[#allocation5 + $0x1b0] sm:$0xff]  }
  0x8b   : > { %v3724_v28 = vrot.slane %v437_v13, 9  ;;  %v3725_v29 = vrot.slane %v436_v12, 9  ;;  %v3726_v30 = vrot.slane %v438_v21, 9  ;;  %v881_v32 = vmax.f32 %v412_v62, %v3719_v17  ;;  %v4477_v62 = vld [vmem:[#allocation5 + $0x1b8] sm:$0xff]  }
  0x8c   : > { %v1265_v31 = vrot.slane %v1263_v23, 7  ;;  %v882_v34 = vmax.f32 %v420_v8, %v3720_v18  ;;  %v883_v35 = vmax.f32 %v419_v7, %v3721_v22  ;;  %v1261_v36 = vor.u32 %v1259_v20, %v1258_v27 }
  0x8d   : > { %v884_v37 = vmax.f32 %v421_v16, %v3722_v25  ;;  %v885_v38 = vmax.f32 %v429_v4, %v3723_v26  ;;  %v886_v39 = vmax.f32 %v437_v13, %v3724_v28  ;;  %v887_v41 = vmax.f32 %v436_v12, %v3725_v29  ;;  %v288_v12 = vld [vmem:[%s4908_s30 + $0x78] sm:$0xff]  ;;  %v289_v25 = vld [vmem:[%s4908_s30 + $0x80] sm:$0xff] }
  0x8e   : > { %v1268_v40 = vor.u32 %v1266_v24, %v1265_v31  ;;  %v888_v42 = vmax.f32 %v438_v21, %v3726_v30  ;;  %v945_v44 = vpack.c.bf16 %v881_v32, %v881_v32  ;;  %v1324_v45 = vsel %vm4919_vm3, 0, %v1261_v36  ;;  %v4476_v21 = vld [vmem:[#allocation5 + $0x170] sm:$0xff]  }
  0x8f   : > { %v946_v46 = vpack.c.bf16 %v882_v34, %v882_v34  ;;  %v947_v47 = vpack.c.bf16 %v883_v35, %v883_v35  ;;  %v948_v48 = vpack.c.bf16 %v884_v37, %v884_v37  ;;  %v4991_v50 = vsel %vm4924_vm5, %v1324_v45, 0  ;;  %v291_v30 = vld [vmem:[%s4908_s30 + $0x90] sm:$0xff]  ;;  %v4483_v35 = vld [vmem:[#allocation5 + $0x1e8] sm:$0xff]  }
  0x90   : > { %v1325_v49 = vsel %vm4919_vm3, 0, %v1268_v40  ;;  %v949_v51 = vpack.c.bf16 %v885_v38, %v885_v38  ;;  %v950_v52 = vpack.c.bf16 %v886_v39, %v886_v39  ;;  %v1352_v54 = vshrl.u32 %v4991_v50, 16  ;;  %v4478_v36 = vld [vmem:[#allocation5 + $0x130] sm:$0xff]  }
  0x91   : > { %v4995_v53 = vsel %vm4924_vm5, %v1325_v49, 0  ;;  %v1354_v55 = vshll.u32 %v4991_v50, 16  ;;  %v3768_v56 = vcombine.low %v4932_v33, %v4991_v50  ;;  %v1409_v61 = vrot.slane %v4991_v50, 1 }
  0x92   : > { %v1359_v57 = vshrl.u32 %v4995_v53, 16  ;;  %v1361_v59 = vshll.u32 %v4995_v53, 16  ;;  %v3771_v60 = vcombine.low %v4991_v50, %v4995_v53  ;;  %v951_v3 = vpack.c.bf16 %v887_v41, %v887_v41 }
  0x93   : > { %v1356_v0 = vrot.slane %v1354_v55, 1  ;;  %v952_v4 = vpack.c.bf16 %v888_v42, %v888_v42  ;;  %v1073_v5 = vunpack.c.l.b16 %v945_v44  ;;  %v3770_v7 = vcombine.low %v4951_v1, %v1409_v61  ;;  %v4480_v44 = vld [vmem:[#allocation5 + $0x168] sm:$0xff]  }
  0x94   : > { %v1363_v6 = vrot.slane %v1361_v59, 1  ;;  %2186 = vmatprep.mubr.bf16.mxu1 %v3771_v60  ;;  %v1074_v8 = vunpack.c.l.b16 %v946_v46  ;;  %v1075_v9 = vunpack.c.l.b16 %v947_v47  ;;  %v1076_v16 = vunpack.c.l.b16 %v948_v48  ;;  %v4482_v60 = vld [vmem:[#allocation5 + $0x128] sm:$0xff]  }
  0x95   : > { %v5011_v13 = vor.u32 %v1356_v0, %v1352_v54  ;;  %v1077_v17 = vunpack.c.l.b16 %v949_v51  ;;  %v1078_v18 = vunpack.c.l.b16 %v950_v52  ;;  %2187 = vmatmul.mubr.bf16.vlgmr.msra.gmra.mxu1 %v3770_v7  ;;  %v1079_v22 = vunpack.c.l.b16 %v951_v3  ;;  %v4485_v52 = vld [vmem:[#allocation5 + $0x1a8] sm:$0xff]   ;;  %v4489_v3 = vld [vmem:[#allocation5 + $0x1a0] sm:$0xff]  }
  0x96   : > { %v5013_v20 = vor.u32 %v1363_v6, %v1359_v57  ;;  %v1080_v23 = vunpack.c.l.b16 %v952_v4  ;;  %v1156_v24 = vrot.slane %v1074_v8, 7  ;;  %4095 = vmatpush3.bf16.msra.mxu1 %v4477_v62  ;;  %v1158_v27 = vrot.slane %v1075_v9, 6  ;;  %v4484_v8 = vld [vmem:[#allocation5 + $0x160] sm:$0xff]  }
  0x97   : > { %v3769_v26 = vcombine.low %v4948_v63, %v5011_v13  ;;  %v1160_v28 = vrot.slane %v1076_v16, 5  ;;  %v1162_v29 = vrot.slane %v1077_v17, 4  ;;  %4096 = vmatprep.subr.bf16.mxu1 %v4479_v2  ;;  %v1164_v34 = vrot.slane %v1078_v18, 3 }
  0x98   : > { %v1157_v32 = vsel %vm1122_vm6, %v1156_v24, %v1073_v5  ;;  %v1166_v38 = vrot.slane %v1079_v22, 2  ;;  %v312_v39 = vmax.f32 %v286_v10, %v288_v12  ;;  %v439_v40 = vcombine.high %v4972_v58, %v4972_v58 }
  0x99   : > { %2121 = vmatprep.mubr.bf16.mxu0 %v3769_v26  ;;  %v1159_v37 = vsel %vm1125_vm7, %v1158_v27, %v1157_v32  ;;  %v1168_v42 = vrot.slane %v1080_v23, 1  ;;  %v446_v45 = vrot.slane %v4972_v58, %v4935_v43  ;;  %v5028_v46 = vmax.f32 %v289_v25, %v291_v30  ;;  %v4487_v58 = vld [vmem:[#allocation5 + $0x1e0] sm:$0xff]   ;;  %v4493_v27 = vld [vmem:[#allocation5 + $0x198] sm:$0xff]  }
  0x9a   : > { %2122 = vmatmul.mubr.bf16.vlgmr.msra.gmra.mxu0 %v3768_v56  ;;  %v1161_v41 = vsel %vm1128_vm8, %v1160_v28, %v1159_v37  ;;  %4097 = vmatpush3.bf16.msra.mxu1 %v4481_v19  ;;  %v453_v48 = vrot.slane %v439_v40, %v4935_v43  ;;  %v456_v49 = vcombine.high %v312_v39, %v312_v39  ;;  %v1410_v51 = vrot.slane %v4995_v53, 1  ;;  %v4486_v26 = vld [vmem:[#allocation5 + $0x120] sm:$0xff]  }
  0x9b   : > { %4055 = vmatpush3.bf16.msra.mxu0 %v4474_v14  ;;  %v1163_v47 = vsel %vm1131_vm9, %v1162_v29, %v1161_v41  ;;  %v454_v55 = vcombine.high %v446_v45, %v446_v45  ;;  %v463_v56 = vrot.slane %v312_v39, %v4935_v43  ;;  %v3727_v57 = vrot.slane %v446_v45, 9  ;;  %4098 = vmatprep.subr.bf16.mxu1 %v4483_v35  ;;  %v4495_v39 = vld [vmem:[#allocation5 + $0x1d0] sm:$0xff]  }
  0x9c   : > { %4056 = vmatprep.subr.bf16.mxu0 %v4476_v21  ;;  %v1165_v54 = vsel %vm1134_vm10, %v1164_v34, %v1163_v47  ;;  %v455_v62 = vcombine.high %v453_v48, %v453_v48  ;;  %v470_v0 = vrot.slane %v456_v49, %v4935_v43  ;;  %v3729_v2 = vrot.slane %v453_v48, 9  ;;  %v4491_v21 = vld [vmem:[#allocation5 + $0x1d8] sm:$0xff]  }
  0x9d   : > { %v1167_v59 = vsel %vm1137_vm11, %v1166_v38, %v1165_v54  ;;  %v471_v5 = vcombine.high %v463_v56, %v463_v56  ;;  %v3728_v6 = vrot.slane %v454_v55, 9  ;;  %v3731_v7 = vrot.slane %v463_v56, 9  ;;  %v4488_v34 = vld [vmem:[#allocation5 + $0x158] sm:$0xff]   ;;  %v4497_v54 = vld [vmem:[#allocation5 + $0x190] sm:$0xff]  }
  0x9e   : > { %v1169_v4 = vsel %vm1140_vm12, %v1168_v42, %v1167_v59  ;;  %v472_v10 = vcombine.high %v470_v0, %v470_v0  ;;  %v3730_v12 = vrot.slane %v455_v62, 9  ;;  %v3733_v14 = vrot.slane %v470_v0, 9  ;;  %4099 = vmatpush3.bf16.msra.mxu1 %v4485_v52  ;;  %v4490_v52 = vld [vmem:[#allocation5 + $0x118] sm:$0xff]   ;;  %v290_v59 = vld [vmem:[%s4908_s30 + $0x88] sm:$0xff] }
  0x9f   : > { %4057 = vmatpush3.bf16.msra.mxu0 %v4478_v36  ;;  %v1242_v9 = vpack.c.b16 %v1169_v4, %v1169_v4  ;;  %v3732_v16 = vrot.slane %v471_v5, 9  ;;  %v889_v17 = vmax.f32 %v446_v45, %v3727_v57  ;;  %v890_v18 = vmax.f32 %v454_v55, %v3728_v6  ;;  %4100 = vmatprep.subr.bf16.mxu1 %v4487_v58  ;;  %v295_v6 = vld [vmem:[%s4908_s30 + $0xb0] sm:$0xff] }
  0xa0   : > { %4058 = vmatprep.subr.bf16.mxu0 %v4480_v44  ;;  %v891_v19 = vmax.f32 %v453_v48, %v3729_v2  ;;  %v3734_v24 = vrot.slane %v472_v10, 9  ;;  %v892_v25 = vmax.f32 %v455_v62, %v3730_v12  ;;  %v893_v28 = vmax.f32 %v463_v56, %v3731_v7  ;;  %v4492_v62 = vld [vmem:[#allocation5 + $0x150] sm:$0xff]   ;;  %v4499_v7 = vld [vmem:[#allocation5 + $0x1c8] sm:$0xff]  }
  0xa1   : > { %v1270_v22 = vshrl.u32 %v1242_v9, 16  ;;  %v1273_v23 = vshll.u32 %v1242_v9, 16  ;;  %v894_v29 = vmax.f32 %v471_v5, %v3732_v16  ;;  %v895_v30 = vmax.f32 %v470_v0, %v3733_v14  ;;  %v293_v5 = vld [vmem:[%s4908_s30 + $0xa0] sm:$0xff] }
  0xa2   : > { %v953_v32 = vpack.c.bf16 %v889_v17, %v889_v17  ;;  %v896_v36 = vmax.f32 %v472_v10, %v3734_v24  ;;  %v954_v37 = vpack.c.bf16 %v890_v18, %v890_v18  ;;  %v955_v38 = vpack.c.bf16 %v891_v19, %v891_v19  ;;  %4101 = vmatpush3.bf16.msra.mxu1 %v4489_v3  ;;  %v4494_v19 = vld [vmem:[#allocation5 + $0x110] sm:$0xff]  }
  0xa3   : > { %v1272_v35 = vrot.slane %v1270_v22, 7  ;;  %4059 = vmatpush3.bf16.msra.mxu0 %v4482_v60  ;;  %v956_v40 = vpack.c.bf16 %v892_v25, %v892_v25  ;;  %v957_v41 = vpack.c.bf16 %v893_v28, %v893_v28  ;;  %v958_v42 = vpack.c.bf16 %v894_v29, %v894_v29  ;;  %4102 = vmatprep.subr.bf16.mxu1 %v4491_v21  ;;  %v292_v60 = vld [vmem:[%s4908_s30 + $0x98] sm:$0xff]  ;;  %v4501_v21 = vld [vmem:[#allocation5 + $0x188] sm:$0xff]  }
  0xa4   : > { %v959_v44 = vpack.c.bf16 %v895_v30, %v895_v30  ;;  %4060 = vmatprep.subr.bf16.mxu0 %v4484_v8  ;;  %v960_v47 = vpack.c.bf16 %v896_v36, %v896_v36  ;;  %v1081_v48 = vunpack.c.l.b16 %v953_v32  ;;  %v1082_v49 = vunpack.c.l.b16 %v954_v37 }
  0xa5   : > { %v1275_v45 = vor.u32 %v1273_v23, %v1272_v35  ;;  %v1083_v55 = vunpack.c.l.b16 %v955_v38  ;;  %v1084_v56 = vunpack.c.l.b16 %v956_v40  ;;  %v1085_v57 = vunpack.c.l.b16 %v957_v41 }
  0xa6   : > { %v1086_v58 = vunpack.c.l.b16 %v958_v42  ;;  %v1087_v2 = vunpack.c.l.b16 %v959_v44  ;;  %v1088_v3 = vunpack.c.l.b16 %v960_v47  ;;  %v1170_v4 = vrot.slane %v1082_v49, 7  ;;  %4103 = vmatpush3.bf16.msra.mxu1 %v4493_v27  ;;  %v4503_v27 = vld [vmem:[#allocation5 + $0x1c0] sm:$0xff]   ;;  %v4498_v42 = vld [vmem:[#allocation5 + $0x108] sm:$0xff]  }
  0xa7   : > { %v1326_v0 = vsel %vm4919_vm3, 0, %v1275_v45  ;;  %4061 = vmatpush3.bf16.msra.mxu0 %v4486_v26  ;;  %v1172_v9 = vrot.slane %v1083_v55, 6  ;;  %v1174_v10 = vrot.slane %v1084_v56, 5  ;;  %v1176_v12 = vrot.slane %v1085_v57, 4  ;;  %4104 = vmatprep.subr.bf16.mxu1 %v4495_v39  ;;  %v4496_v26 = vld [vmem:[#allocation5 + $0x148] sm:$0xff]   ;;  %v4504_v55 = vld [vmem:[#allocation5 + $0x180] sm:$0xff]  }
  0xa8   : > { %v5046_v8 = vsel %vm4924_vm5, %v1326_v0, 0  ;;  %4062 = vmatprep.subr.bf16.mxu0 %v4488_v34  ;;  %v1171_v18 = vsel %vm1122_vm6, %v1170_v4, %v1081_v48  ;;  %v1178_v23 = vrot.slane %v1086_v58, 3  ;;  %v1180_v24 = vrot.slane %v1087_v2, 2 }
  0xa9   : > { %v1366_v14 = vshrl.u32 %v5046_v8, 16  ;;  %v1368_v16 = vshll.u32 %v5046_v8, 16  ;;  %v5052_v17 = vcombine.low %v4995_v53, %v5046_v8  ;;  %v1173_v22 = vsel %vm1125_vm7, %v1172_v9, %v1171_v18 }
  0xaa   : > { %v1182_v25 = vrot.slane %v1088_v3, 1  ;;  %v1175_v29 = vsel %vm1128_vm8, %v1174_v10, %v1173_v22  ;;  %v5596_v30 = vrot.slane %v5046_v8, 1  ;;  %v314_v32 = vmax.f32 %v290_v59, %v292_v60  ;;  %4105 = vmatpush3.bf16.msra.mxu1 %v4497_v54  ;;  %v4500_v60 = vld [vmem:[#allocation5 + $0x140] sm:$0xff]  }
  0xab   : > { %v1370_v28 = vrot.slane %v1368_v16, 1  ;;  %4063 = vmatpush3.bf16.msra.mxu0 %v4490_v52  ;;  %v1177_v34 = vsel %vm1131_vm9, %v1176_v12, %v1175_v29  ;;  %v473_v35 = vcombine.high %v5028_v46, %v5028_v46  ;;  %v480_v36 = vrot.slane %v5028_v46, %v4935_v43  ;;  %4106 = vmatprep.subr.bf16.mxu1 %v4499_v7  ;;  %v4502_v16 = vld [vmem:[#allocation5 + $0x100] sm:$0xff]  }
  0xac   : > { %v5063_v37 = vmax.f32 %v293_v5, %v295_v6  ;;  %4064 = vmatprep.subr.bf16.mxu0 %v4492_v62  ;;  %v1179_v39 = vsel %vm1134_vm10, %v1178_v23, %v1177_v34  ;;  %v5072_v40 = vcombine.low %v1410_v51, %v5596_v30  ;;  %v490_v41 = vcombine.high %v314_v32, %v314_v32  ;;  %v5085_v23 = vld [vmem:[#allocation5 + $0x238] sm:$0xff]  }
  0xad   : > { %v5065_v38 = vor.u32 %v1370_v28, %v1366_v14  ;;  %v1181_v44 = vsel %vm1137_vm11, %v1180_v24, %v1179_v39  ;;  %v487_v46 = vrot.slane %v473_v35, %v4935_v43  ;;  %v488_v45 = vcombine.high %v480_v36, %v480_v36 }
  0xae   : > { %v497_v47 = vrot.slane %v314_v32, %v4935_v43  ;;  %v1183_v49 = vsel %vm1140_vm12, %v1182_v25, %v1181_v44  ;;  %v504_v52 = vrot.slane %v490_v41, %v4935_v43  ;;  %v3735_v54 = vrot.slane %v480_v36, 9  ;;  %4107 = vmatpush3.bf16.msra.mxu1 %v4501_v21 }
  0xaf   : > { %v5079_v48 = vcombine.low %v5013_v20, %v5065_v38  ;;  %4065 = vmatpush3.bf16.msra.mxu0 %v4494_v19  ;;  %v1243_v56 = vpack.c.b16 %v1183_v49, %v1183_v49  ;;  %v489_v57 = vcombine.high %v487_v46, %v487_v46  ;;  %v3736_v59 = vrot.slane %v488_v45, 9  ;;  %4108 = vmatprep.subr.bf16.mxu1 %v4503_v27  ;;  %v296_v49 = vld [vmem:[%s4908_s30 + $0xb8] sm:$0xff] }
  0xb0   : > { %v505_v58 = vcombine.high %v497_v47, %v497_v47  ;;  %4066 = vmatprep.subr.bf16.mxu0 %v4496_v26  ;;  %v506_v62 = vcombine.high %v504_v52, %v504_v52  ;;  %v3737_v0 = vrot.slane %v487_v46, 9  ;;  %v3739_v2 = vrot.slane %v497_v47, 9 }
  0xb1   : > { %2129 = vmatprep.mubr.bf16.mxu0 %v5079_v48  ;;  %v3741_v3 = vrot.slane %v504_v52, 9  ;;  %v1277_v4 = vshrl.u32 %v1243_v56, 16  ;;  %v1280_v5 = vshll.u32 %v1243_v56, 16  ;;  %v3738_v6 = vrot.slane %v489_v57, 9 }
  0xb2   : > { %2130 = vmatmul.mubr.bf16.gmra.mxu0 %v5052_v17  ;;  %v3740_v7 = vrot.slane %v505_v58, 9  ;;  %v3742_v9 = vrot.slane %v506_v62, 9  ;;  %v897_v10 = vmax.f32 %v480_v36, %v3735_v54  ;;  %v898_v12 = vmax.f32 %v488_v45, %v3736_v59  ;;  %4109 = vmatpush3.bf16.msra.mxu1 %v4504_v55 }
  0xb3   : > { %v899_v14 = vmax.f32 %v487_v46, %v3737_v0  ;;  %4067 = vmatpush3.bf16.msra.mxu0 %v4498_v42  ;;  %v1279_v18 = vrot.slane %v1277_v4, 7  ;;  %v900_v19 = vmax.f32 %v489_v57, %v3738_v6  ;;  %v901_v21 = vmax.f32 %v497_v47, %v3739_v2  ;;  %v294_v47 = vld [vmem:[%s4908_s30 + $0xa8] sm:$0xff]  ;;  %v297_v57 = vld [vmem:[%s4908_s30 + $0xc0] sm:$0xff] }
  0xb4   : > { %v902_v22 = vmax.f32 %v505_v58, %v3740_v7  ;;  %4068 = vmatprep.subr.bf16.mxu0 %v4500_v60  ;;  %v903_v24 = vmax.f32 %v504_v52, %v3741_v3  ;;  %v904_v25 = vmax.f32 %v506_v62, %v3742_v9  ;;  %v961_v26 = vpack.c.bf16 %v897_v10, %v897_v10  ;;  %v299_v58 = vld [vmem:[%s4908_s30 + $0xd0] sm:$0xff] }
  0xb5   : > { %v962_v27 = vpack.c.bf16 %v898_v12, %v898_v12  ;;  %v1282_v28 = vor.u32 %v1280_v5, %v1279_v18  ;;  %v963_v29 = vpack.c.bf16 %v899_v14, %v899_v14  ;;  %v964_v32 = vpack.c.bf16 %v900_v19, %v900_v19 }
  0xb6   : > { %v965_v34 = vpack.c.bf16 %v901_v21, %v901_v21  ;;  %v966_v35 = vpack.c.bf16 %v902_v22, %v902_v22  ;;  %v967_v36 = vpack.c.bf16 %v903_v24, %v903_v24  ;;  %v968_v39 = vpack.c.bf16 %v904_v25, %v904_v25 }
  0xb7   : > { %v1089_v41 = vunpack.c.l.b16 %v961_v26  ;;  %4069 = vmatpush3.bf16.msra.mxu0 %v4502_v16  ;;  %v1327_v42 = vsel %vm4919_vm3, 0, %v1282_v28  ;;  %v1090_v44 = vunpack.c.l.b16 %v962_v27  ;;  %v1091_v46 = vunpack.c.l.b16 %v963_v29 }
  0xb8   : > { %v1092_v45 = vunpack.c.l.b16 %v964_v32  ;;  %4318 = vmatprep.subr.bf16.mxu0 %v5085_v23  ;;  %v5094_v52 = vsel %vm4924_vm5, %v1327_v42, 0  ;;  %v1093_v54 = vunpack.c.l.b16 %v965_v34  ;;  %v1094_v55 = vunpack.c.l.b16 %v966_v35 }
  0xb9   : > { %v1095_v56 = vunpack.c.l.b16 %v967_v36  ;;  %v3777_v59 = vcombine.low %v5046_v8, %v5094_v52  ;;  %v1096_v60 = vunpack.c.l.b16 %v968_v39  ;;  %v1184_v62 = vrot.slane %v1090_v44, 7 }
  0xba   : > { %v1186_v0 = vrot.slane %v1091_v46, 6  ;;  %v1188_v2 = vrot.slane %v1092_v45, 5  ;;  %v1190_v3 = vrot.slane %v1093_v54, 4  ;;  %v1192_v4 = vrot.slane %v1094_v55, 3 }
  0xbb   : > { %v1194_v5 = vrot.slane %v1095_v56, 2  ;;  %2194 = vmatprep.mubr.bf16.mxu1 %v3777_v59  ;;  %v1185_v6 = vsel %vm1122_vm6, %v1184_v62, %v1089_v41  ;;  %v1196_v7 = vrot.slane %v1096_v60, 1  ;;  %v1373_v9 = vshrl.u32 %v5094_v52, 16 }
  0xbc   : > { %v1375_v10 = vshll.u32 %v5094_v52, 16  ;;  %2195 = vmatmul.mubr.bf16.gmra.mxu1 %v5072_v40  ;;  %v1187_v12 = vsel %vm1125_vm7, %v1186_v0, %v1185_v6  ;;  %v316_v14 = vmax.f32 %v294_v47, %v296_v49  ;;  %v507_v16 = vcombine.high %v5063_v37, %v5063_v37 }
  0xbd   : > { %v514_v18 = vrot.slane %v5063_v37, %v4935_v43  ;;  %v1189_v19 = vsel %vm1128_vm8, %v1188_v2, %v1187_v12  ;;  %v1412_v22 = vrot.slane %v5094_v52, 1  ;;  %v5111_v24 = vmax.f32 %v297_v57, %v299_v58 }
  0xbe   : > { %v1377_v21 = vrot.slane %v1375_v10, 1  ;;  %v1191_v25 = vsel %vm1131_vm9, %v1190_v3, %v1189_v19  ;;  %v521_v26 = vrot.slane %v507_v16, %v4935_v43  ;;  %v524_v28 = vcombine.high %v316_v14, %v316_v14 }
  0xbf   : > { %v522_v27 = vcombine.high %v514_v18, %v514_v18  ;;  %v1193_v29 = vsel %vm1134_vm10, %v1192_v4, %v1191_v25  ;;  %v531_v34 = vrot.slane %v316_v14, %v4935_v43  ;;  %v3743_v37 = vrot.slane %v514_v18, 9 }
  0xc0   : > { %v5116_v32 = vor.u32 %v1377_v21, %v1373_v9  ;;  %v1195_v35 = vsel %vm1137_vm11, %v1194_v5, %v1193_v29  ;;  %v523_v36 = vcombine.high %v521_v26, %v521_v26  ;;  %v538_v39 = vrot.slane %v524_v28, %v4935_v43 }
  0xc1   : > { %v3744_v41 = vrot.slane %v522_v27, 9  ;;  %v1197_v42 = vsel %vm1140_vm12, %v1196_v7, %v1195_v35  ;;  %v539_v44 = vcombine.high %v531_v34, %v531_v34  ;;  %v3745_v46 = vrot.slane %v521_v26, 9  ;;  %v298_v35 = vld [vmem:[%s4908_s30 + $0xc8] sm:$0xff] }
  0xc2   : > { %v3747_v45 = vrot.slane %v531_v34, 9  ;;  %v1244_v47 = vpack.c.b16 %v1197_v42, %v1197_v42  ;;  %v540_v49 = vcombine.high %v538_v39, %v538_v39  ;;  %v3746_v54 = vrot.slane %v523_v36, 9 }
  0xc3   : > { %v3749_v55 = vrot.slane %v538_v39, 9  ;;  %v3748_v56 = vrot.slane %v539_v44, 9  ;;  %v905_v57 = vmax.f32 %v514_v18, %v3743_v37  ;;  %v906_v58 = vmax.f32 %v522_v27, %v3744_v41 }
  0xc4   : > { %v907_v59 = vmax.f32 %v521_v26, %v3745_v46  ;;  %v1284_v60 = vshrl.u32 %v1244_v47, 16  ;;  %v1287_v62 = vshll.u32 %v1244_v47, 16  ;;  %v3750_v0 = vrot.slane %v540_v49, 9  ;;  %v301_v46 = vld [vmem:[%s4908_s30 + $0xe0] sm:$0xff] }
  0xc5   : > { %v908_v2 = vmax.f32 %v523_v36, %v3746_v54  ;;  %v909_v3 = vmax.f32 %v531_v34, %v3747_v45  ;;  %v910_v4 = vmax.f32 %v539_v44, %v3748_v56  ;;  %v911_v5 = vmax.f32 %v538_v39, %v3749_v55  ;;  %v300_v36 = vld [vmem:[%s4908_s30 + $0xd8] sm:$0xff]  ;;  %v303_v45 = vld [vmem:[%s4908_s30 + $0xf0] sm:$0xff] }
  0xc6   : > { %v969_v6 = vpack.c.bf16 %v905_v57, %v905_v57  ;;  %v1286_v7 = vrot.slane %v1284_v60, 7  ;;  %v912_v9 = vmax.f32 %v540_v49, %v3750_v0  ;;  %v970_v10 = vpack.c.bf16 %v906_v58, %v906_v58 }
  0xc7   : > { %v971_v12 = vpack.c.bf16 %v907_v59, %v907_v59  ;;  %v972_v14 = vpack.c.bf16 %v908_v2, %v908_v2  ;;  %v973_v16 = vpack.c.bf16 %v909_v3, %v909_v3  ;;  %v974_v19 = vpack.c.bf16 %v910_v4, %v910_v4 }
  0xc8   : > { %v975_v18 = vpack.c.bf16 %v911_v5, %v911_v5  ;;  %v1289_v21 = vor.u32 %v1287_v62, %v1286_v7  ;;  %v976_v25 = vpack.c.bf16 %v912_v9, %v912_v9  ;;  %v1097_v26 = vunpack.c.l.b16 %v969_v6 }
  0xc9   : > { %v1098_v27 = vunpack.c.l.b16 %v970_v10  ;;  %v1099_v28 = vunpack.c.l.b16 %v971_v12  ;;  %v1100_v29 = vunpack.c.l.b16 %v972_v14  ;;  %v1101_v34 = vunpack.c.l.b16 %v973_v16 }
  0xca   : > { %v1102_v37 = vunpack.c.l.b16 %v974_v19  ;;  %v1328_v39 = vsel %vm4919_vm3, 0, %v1289_v21  ;;  %v1103_v41 = vunpack.c.l.b16 %v975_v18  ;;  %v1104_v42 = vunpack.c.l.b16 %v976_v25 }
  0xcb   : > { %v1198_v44 = vrot.slane %v1098_v27, 7  ;;  %v5130_v47 = vsel %vm4924_vm5, %v1328_v39, 0  ;;  %v1200_v49 = vrot.slane %v1099_v28, 6  ;;  %v1202_v54 = vrot.slane %v1100_v29, 5 }
  0xcc   : > { %v1204_v55 = vrot.slane %v1101_v34, 4  ;;  %v1380_v56 = vshrl.u32 %v5130_v47, 16  ;;  %v1382_v57 = vshll.u32 %v5130_v47, 16  ;;  %v5136_v58 = vcombine.low %v5094_v52, %v5130_v47 }
  0xcd   : > { %v1199_v59 = vsel %vm1122_vm6, %v1198_v44, %v1097_v26  ;;  %v1206_v62 = vrot.slane %v1102_v37, 3  ;;  %v1208_v0 = vrot.slane %v1103_v41, 2  ;;  %v1210_v2 = vrot.slane %v1104_v42, 1 }
  0xce   : > { %v1201_v60 = vsel %vm1125_vm7, %v1200_v49, %v1199_v59  ;;  %v1384_v3 = vrot.slane %v1382_v57, 1  ;;  %v5595_v5 = vrot.slane %v5130_v47, 1  ;;  %v318_v6 = vmax.f32 %v298_v35, %v300_v36 }
  0xcf   : > { %v1203_v4 = vsel %vm1128_vm8, %v1202_v54, %v1201_v60  ;;  %v541_v9 = vcombine.high %v5111_v24, %v5111_v24  ;;  %v548_v10 = vrot.slane %v5111_v24, %v4935_v43  ;;  %v5147_v12 = vmax.f32 %v301_v46, %v303_v45 }
  0xd0   : > { %v1205_v7 = vsel %vm1131_vm9, %v1204_v55, %v1203_v4  ;;  %v5149_v14 = vor.u32 %v1384_v3, %v1380_v56  ;;  %v5156_v19 = vcombine.low %v1412_v22, %v5595_v5  ;;  %v558_v18 = vcombine.high %v318_v6, %v318_v6 }
  0xd1   : > { %v1207_v16 = vsel %vm1134_vm10, %v1206_v62, %v1205_v7  ;;  %v555_v25 = vrot.slane %v541_v9, %v4935_v43  ;;  %v556_v26 = vcombine.high %v548_v10, %v548_v10  ;;  %v565_v24 = vrot.slane %v318_v6, %v4935_v43 }
  0xd2   : > { %v1209_v21 = vsel %vm1137_vm11, %v1208_v0, %v1207_v16  ;;  %v5163_v27 = vcombine.low %v5116_v32, %v5149_v14  ;;  %v572_v29 = vrot.slane %v558_v18, %v4935_v43  ;;  %v3751_v34 = vrot.slane %v548_v10, 9 }
  0xd3   : > { %v1211_v28 = vsel %vm1140_vm12, %v1210_v2, %v1209_v21  ;;  %v557_v35 = vcombine.high %v555_v25, %v555_v25  ;;  %v573_v36 = vcombine.high %v565_v24, %v565_v24  ;;  %v3752_v39 = vrot.slane %v556_v26, 9 }
  0xd4   : > { %v1245_v37 = vpack.c.b16 %v1211_v28, %v1211_v28  ;;  %2137 = vmatprep.mubr.bf16.mxu0 %v5163_v27  ;;  %v574_v41 = vcombine.high %v572_v29, %v572_v29  ;;  %v3753_v42 = vrot.slane %v555_v25, 9  ;;  %v3755_v44 = vrot.slane %v565_v24, 9 }
  0xd5   : > { %v3757_v46 = vrot.slane %v572_v29, 9  ;;  %2138 = vmatmul.mubr.bf16.gmra.mxu0 %v5136_v58  ;;  %v3754_v54 = vrot.slane %v557_v35, 9  ;;  %v3756_v55 = vrot.slane %v573_v36, 9  ;;  %v913_v57 = vmax.f32 %v548_v10, %v3751_v34 }
  0xd6   : > { %v1291_v45 = vshrl.u32 %v1245_v37, 16  ;;  %v1294_v49 = vshll.u32 %v1245_v37, 16  ;;  %v3758_v56 = vrot.slane %v574_v41, 9  ;;  %v914_v59 = vmax.f32 %v556_v26, %v3752_v39 }
  0xd7   : > { %v915_v60 = vmax.f32 %v555_v25, %v3753_v42  ;;  %v916_v0 = vmax.f32 %v557_v35, %v3754_v54  ;;  %v917_v2 = vmax.f32 %v565_v24, %v3755_v44  ;;  %v918_v3 = vmax.f32 %v573_v36, %v3756_v55  ;;  %v304_v42 = vld [vmem:[%s4908_s30 + $0xf8] sm:$0xff] }
  0xd8   : > { %v1293_v62 = vrot.slane %v1291_v45, 7  ;;  %v919_v4 = vmax.f32 %v572_v29, %v3757_v46  ;;  %v920_v6 = vmax.f32 %v574_v41, %v3758_v56  ;;  %v977_v7 = vpack.c.bf16 %v913_v57, %v913_v57  ;;  %v302_v29 = vld [vmem:[%s4908_s30 + $0xe8] sm:$0xff]  ;;  %s4671_s30 = scalar_lea.vmem %s4670_s29, 2048 }
  0xd9   : > { %v978_v9 = vpack.c.bf16 %v914_v59, %v914_v59  ;;  %v979_v18 = vpack.c.bf16 %v915_v60, %v915_v60  ;;  %v980_v21 = vpack.c.bf16 %v916_v0, %v916_v0  ;;  %v981_v28 = vpack.c.bf16 %v917_v2, %v917_v2  ;;  %p4673_p12 = scmp.lt.s32.totalorder %s4671_s30, %s4665_s17 }
  0xda   : > { %v1296_v16 = vor.u32 %v1294_v49, %v1293_v62  ;;  %v982_v37 = vpack.c.bf16 %v918_v3, %v918_v3  ;;  %v983_v5 = vpack.c.bf16 %v919_v4, %v919_v4  ;;  %v984_v31 = vpack.c.bf16 %v920_v6, %v920_v6 }
  0xdb   : > { %v1105_v10 = vunpack.c.l.b16 %v977_v7  ;;  %v1106_v26 = vunpack.c.l.b16 %v978_v9  ;;  %v1107_v24 = vunpack.c.l.b16 %v979_v18  ;;  %v1108_v34 = vunpack.c.l.b16 %v980_v21  ;;  %p4674_p7 = por %p4673_p12, %p4672_p6 }
  0xdc   : > { %v1329_v25 = vsel %vm4919_vm3, 0, %v1296_v16  ;;  %v1109_v36 = vunpack.c.l.b16 %v981_v28  ;;  %v1110_v39 = vunpack.c.l.b16 %v982_v37  ;;  %v1111_v41 = vunpack.c.l.b16 %v983_v5 }
  0xdd   : > { %v5174_v35 = vsel %vm4924_vm5, %v1329_v25, 0  ;;  %v1112_v46 = vunpack.c.l.b16 %v984_v31  ;;  %v1212_v45 = vrot.slane %v1106_v26, 7  ;;  %v1214_v49 = vrot.slane %v1107_v24, 6  ;;  %p4675_p9 = pnand %p4674_p7, %p4668_p2 }
  0xde   : > { %v3783_v44 = vcombine.low %v5130_v47, %v5174_v35  ;;  %v1216_v54 = vrot.slane %v1108_v34, 5  ;;  %v1218_v55 = vrot.slane %v1109_v36, 4  ;;  %v1220_v57 = vrot.slane %v1110_v39, 3 }
  0xdf   : > { %v1213_v56 = vsel %vm1122_vm6, %v1212_v45, %v1105_v10  ;;  %v1222_v59 = vrot.slane %v1111_v41, 2  ;;  %v1389_v60 = vshll.u32 %v5174_v35, 16  ;;  %v320_v62 = vmax.f32 %v302_v29, %v304_v42 }
  0xe0   : > { %2202 = vmatprep.mubr.bf16.mxu1 %v3783_v44  ;;  %v1215_v5 = vsel %vm1125_vm7, %v1214_v49, %v1213_v56  ;;  %v575_v0 = vcombine.high %v5147_v12, %v5147_v12  ;;  %v582_v31 = vrot.slane %v5147_v12, %v4935_v43  ;;  %v1224_v3 = vrot.slane %v1112_v46, 1 }
  0xe1   : > { %2203 = vmatmul.mubr.bf16.gmra.mxu1 %v5156_v19  ;;  %v1217_v2 = vsel %vm1128_vm8, %v1216_v54, %v1215_v5  ;;  %v1387_v4 = vshrl.u32 %v5174_v35, 16  ;;  %v592_v16 = vcombine.high %v320_v62, %v320_v62  ;;  %v1391_v21 = vrot.slane %v1389_v60, 1 }
  0xe2   : > { %v1219_v6 = vsel %vm1131_vm9, %v1218_v55, %v1217_v2  ;;  %v589_v7 = vrot.slane %v575_v0, %v4935_v43  ;;  %v590_v9 = vcombine.high %v582_v31, %v582_v31  ;;  %v599_v28 = vrot.slane %v320_v62, %v4935_v43 }
  0xe3   : > { %v1221_v18 = vsel %vm1134_vm10, %v1220_v57, %v1219_v6  ;;  %v3759_v37 = vrot.slane %v582_v31, 9  ;;  %v606_v25 = vrot.slane %v592_v16, %v4935_v43  ;;  %v5627_v53 = vrot.slane %v5046_v8, 1  ;;  %v4507_v8 = vld [vmem:[#allocation5 + $0x228] sm:$0xff]  }
  0xe4   : > { %v1223_v10 = vsel %vm1137_vm11, %v1222_v59, %v1221_v18  ;;  %v591_v12 = vcombine.high %v589_v7, %v589_v7  ;;  %v3760_v26 = vrot.slane %v590_v9, 9  ;;  %v607_v34 = vcombine.high %v599_v28, %v599_v28 }
  0xe5   : > { %v1225_v24 = vsel %vm1140_vm12, %v1224_v3, %v1223_v10  ;;  %v3761_v29 = vrot.slane %v589_v7, 9  ;;  %v3763_v36 = vrot.slane %v599_v28, 9  ;;  %v608_v41 = vcombine.high %v606_v25, %v606_v25 }
  0xe6   : > { %v1246_v39 = vpack.c.b16 %v1225_v24, %v1225_v24  ;;  %v3762_v42 = vrot.slane %v591_v12, 9  ;;  %v3765_v44 = vrot.slane %v606_v25, 9  ;;  %v3764_v46 = vrot.slane %v607_v34, 9 }
  0xe7   : > { %v921_v45 = vmax.f32 %v582_v31, %v3759_v37  ;;  %v922_v49 = vmax.f32 %v590_v9, %v3760_v26  ;;  %v923_v54 = vmax.f32 %v589_v7, %v3761_v29  ;;  %v3766_v57 = vrot.slane %v608_v41, 9 }
  0xe8   : > { %v1298_v55 = vshrl.u32 %v1246_v39, 16  ;;  %v1301_v56 = vshll.u32 %v1246_v39, 16  ;;  %v924_v59 = vmax.f32 %v591_v12, %v3762_v42  ;;  %v925_v60 = vmax.f32 %v599_v28, %v3763_v36 }
  0xe9   : > { %v926_v43 = vmax.f32 %v607_v34, %v3764_v46  ;;  %v927_v5 = vmax.f32 %v606_v25, %v3765_v44  ;;  %v985_v62 = vpack.c.bf16 %v921_v45, %v921_v45  ;;  %v928_v2 = vmax.f32 %v608_v41, %v3766_v57 }
  0xea   : > { %v1300_v0 = vrot.slane %v1298_v55, 7  ;;  %v986_v3 = vpack.c.bf16 %v922_v49, %v922_v49  ;;  %v987_v6 = vpack.c.bf16 %v923_v54, %v923_v54  ;;  %v988_v16 = vpack.c.bf16 %v924_v59, %v924_v59 }
  0xeb   : > { %v989_v18 = vpack.c.bf16 %v925_v60, %v925_v60  ;;  %v990_v10 = vpack.c.bf16 %v926_v43, %v926_v43  ;;  %v991_v24 = vpack.c.bf16 %v927_v5, %v927_v5  ;;  %v992_v31 = vpack.c.bf16 %v928_v2, %v928_v2 }
  0xec   : > { %v1303_v30 = vor.u32 %v1301_v56, %v1300_v0  ;;  %v1113_v9 = vunpack.c.l.b16 %v985_v62  ;;  %v1114_v7 = vunpack.c.l.b16 %v986_v3  ;;  %v1115_v37 = vunpack.c.l.b16 %v987_v6 }
  0xed   : > { %v1116_v26 = vunpack.c.l.b16 %v988_v16  ;;  %v1117_v29 = vunpack.c.l.b16 %v989_v18  ;;  %v1118_v12 = vunpack.c.l.b16 %v990_v10  ;;  %v1119_v25 = vunpack.c.l.b16 %v991_v24 }
  0xee   : > { %v1330_v28 = vsel %vm4919_vm3, 0, %v1303_v30  ;;  %v1120_v34 = vunpack.c.l.b16 %v992_v31  ;;  %v1226_v36 = vrot.slane %v1114_v7, 7  ;;  %v1228_v41 = vrot.slane %v1115_v37, 6 }
  0xef   : > { %v5200_v39 = vsel %vm4924_vm5, %v1330_v28, 0  ;;  %v1230_v42 = vrot.slane %v1116_v26, 5  ;;  %v1232_v44 = vrot.slane %v1117_v29, 4  ;;  %v1234_v55 = vrot.slane %v1118_v12, 3  ;;  %v4508_v12 = vld [vmem:[#allocation5 + $0x220] sm:$0xff]   ;;  %v4510_v28 = vld [vmem:[#allocation5 + $0x210] sm:$0xff]  }
  0xf0   : > { %v1394_v46 = vshrl.u32 %v5200_v39, 16  ;;  %v1396_v45 = vshll.u32 %v5200_v39, 16  ;;  %v1227_v49 = vsel %vm1122_vm6, %v1226_v36, %v1113_v9  ;;  %v1236_v30 = vrot.slane %v1119_v25, 2 }
  0xf1   : > { %v1229_v54 = vsel %vm1125_vm7, %v1228_v41, %v1227_v49  ;;  %v1392_v56 = vor.u32 %v1391_v21, %v1387_v4  ;;  %v1238_v60 = vrot.slane %v1120_v34, 1  ;;  %v5215_v0 = vcombine.low %v5174_v35, %v5200_v39  ;;  %v4511_v34 = vld [vmem:[#allocation5 + $0x208] sm:$0xff]   ;;  %v4515_v41 = vld [vmem:[#allocation7 + $0xb8] sm:$0xff]   ;;  %v4520_v49 = vld [vmem:[#allocation7 + $0x30] sm:$0xff]  }
  0xf2   : > { %v1398_v57 = vrot.slane %v1396_v45, 1  ;;  %v1231_v59 = vsel %vm1128_vm8, %v1230_v42, %v1229_v54  ;;  %v3773_v21 = vcombine.low %v1409_v61, %v1410_v51  ;;  %v1414_v24 = vrot.slane %v5174_v35, 1  ;;  %v4506_v61 = vld [vmem:[#allocation5 + $0x230] sm:$0xff]   ;;  %v4514_v42 = vld [vmem:[#allocation7 + $0x78] sm:$0xff]   ;;  %v4523_v54 = vld [vmem:[#allocation7 + $0xa8] sm:$0xff]  }
  0xf3   : > { %v1233_v43 = vsel %vm1131_vm9, %v1232_v44, %v1231_v59  ;;  %v1415_v31 = vrot.slane %v5200_v39, 1  ;;  %v3779_v7 = vcombine.low %v5627_v53, %v1412_v22  ;;  %v5628_v35 = vcombine.low %v5011_v13, %v5013_v20  ;;  %4146 = vmatprep.subr.bf16.mxu1 %v4514_v42  ;;  %v4517_v44 = vld [vmem:[#allocation7 + $0xf0] sm:$0xff]   ;;  %v4526_v59 = vld [vmem:[#allocation7 + $0x60] sm:$0xff]  }
  0xf4   : > { %v5210_v5 = vor.u32 %v1398_v57, %v1394_v46  ;;  %v1235_v62 = vsel %vm1134_vm10, %v1234_v55, %v1233_v43  ;;  %v3778_v52 = vcombine.low %v5065_v38, %v5116_v32  ;;  %v5629_v22 = vrot.slane %v5130_v47, 1  ;;  %v4519_v46 = vld [vmem:[#allocation7 + $0xb0] sm:$0xff]   ;;  %v4522_v55 = vld [vmem:[#allocation7 + $0x68] sm:$0xff]   ;;  %v4527_v57 = vld [vmem:[#allocation7 + $0xa0] sm:$0xff]  }
  0xf5   : > { %v1237_v2 = vsel %vm1137_vm11, %v1236_v30, %v1235_v62  ;;  %v3788_v37 = vcombine.low %v1414_v24, %v1415_v31  ;;  %v4518_v45 = vld [vmem:[#allocation7 + $0x70] sm:$0xff]   ;;  %v4524_v30 = vld [vmem:[#allocation7 + $0x28] sm:$0xff]   ;;  %v4529_v43 = vld [vmem:[#allocation7 + $0xd8] sm:$0xff]  }
  0xf6   : > { %v3787_v3 = vcombine.low %v1392_v56, %v5210_v5  ;;  %v1239_v4 = vsel %vm1140_vm12, %v1238_v60, %v1237_v2  ;;  %v3785_v29 = vcombine.low %v5629_v22, %v1414_v24  ;;  %v4528_v60 = vld [vmem:[#allocation7 + $0x20] sm:$0xff]   ;;  %v4530_v62 = vld [vmem:[#allocation7 + $0x58] sm:$0xff]   ;;  %v4533_v2 = vld [vmem:[#allocation7 + $0xd0] sm:$0xff]  }
  0xf7   : > { %v1247_v6 = vpack.c.b16 %v1239_v4, %v1239_v4  ;;  %v4534_v4 = vld [vmem:[#allocation7 + $0x50] sm:$0xff]   ;;  %v4541_v24 = vld [vmem:[#allocation7 + $0xc0] sm:$0xff]  }
  0xf8   : > { %2145 = vmatprep.mubr.bf16.mxu0 %v3787_v3  ;;  %v4544_v53 = vld [vmem:[#allocation7] sm:$0xff]  }
  0xf9   : > { %2146 = vmatmul.mubr.bf16.gmra.mxu0 %v5215_v0  ;;  %v1305_v16 = vshrl.u32 %v1247_v6, 16  ;;  %v1308_v18 = vshll.u32 %v1247_v6, 16  ;;  %v4537_v6 = vld [vmem:[#allocation7 + $0xc8] sm:$0xff]  }
  0xfa   : > { %2251 = vmatprep.mubr.bf16.mxu0 %v3773_v21  ;;  %v4536_v21 = vld [vmem:[#allocation7 + $0x10] sm:$0xff]  }
  0xfb   : > { %v1307_v10 = vrot.slane %v1305_v16, 7  ;;  %v4539_v16 = vld [vmem:[#allocation7 + $0x88] sm:$0xff]  }
  0xfd   : > { %v1310_v9 = vor.u32 %v1308_v18, %v1307_v10  ;;  %v4538_v18 = vld [vmem:[#allocation7 + $0x48] sm:$0xff]  }
  0xfe   : > { %v4540_v10 = vld [vmem:[#allocation7 + $0x8] sm:$0xff]  }
  0xff   : > { %v1331_v50 = vsel %vm4919_vm3, 0, %v1310_v9  ;;  %v4542_v9 = vld [vmem:[#allocation7 + $0x40] sm:$0xff]  }
 0x100   : > { %v1343_v51 = vsel %vm4924_vm5, %v1331_v50, 0  ;;  %v4546_v50 = vld [vmem:[#allocation7 + $0x178] sm:$0xff]  }
 0x101   : > { %v3789_v26 = vcombine.low %v5200_v39, %v1343_v51  ;;  %2252 = vmatmul.mubr.bf16.vlgmr.msra.gmra.mxu0 %v5628_v35  ;;  %v1419_v13 = vshll.u32 %v1343_v51, 16  ;;  %v1424_v20 = vrot.slane %v1343_v51, 1  ;;  %v1417_v38 = vshrl.u32 %v1343_v51, 16  ;;  %v4513_v39 = vld [vmem:[#allocation7 + $0xf8] sm:$0xff]  }
 0x102   : > { %4319 = vmatpush3.bf16.msra.mxu0 %v5085_v23  ;;  %2259 = vmatprep.mubr.bf16.mxu0 %v3779_v7  ;;  %v4509_v23 = vld [vmem:[#allocation5 + $0x218] sm:$0xff]   ;;  %v3792_v36 = vcombine.low %v1343_v51, %v4932_v33 }
 0x103   : > { %2210 = vmatprep.mubr.bf16.mxu1 %v3789_v26  ;;  %4320 = vmatprep.subr.bf16.mxu0 %v4506_v61  ;;  %v1421_v32 = vrot.slane %v1419_v13, 1  ;;  %v3791_v47 = vcombine.low %v1415_v31, %v1424_v20  ;;  %v4543_v31 = vld [vmem:[#allocation7 + $0x80] sm:$0xff]   ;;  %v4545_v7 = vld [vmem:[#allocation7 + $0x1f8] sm:$0xff]  }
 0x104   : > { %2211 = vmatmul.mubr.bf16.gmra.mxu1 %v3788_v37 }
 0x105   : > { %2316 = vmatprep.mubr.bf16.mxu1 %v5079_v48  ;;  %v3784_v48 = vcombine.low %v5149_v14, %v1392_v56  ;;  %v1422_v25 = vor.u32 %v1421_v32, %v1417_v38  ;;  %v4512_v14 = vld [vmem:[#allocation5 + $0x200] sm:$0xff]  }
 0x106   : > { %4321 = vmatpush3.bf16.msra.mxu0 %v4506_v61  ;;  %v4525_v56 = vld [vmem:[#allocation7 + $0xe0] sm:$0xff]  }
 0x107   : > { %4322 = vmatprep.subr.bf16.mxu0 %v4507_v8 }
 0x109   : > { %2260 = vmatmul.mubr.bf16.gmra.mxu0 %v3778_v52 }
 0x10a   : > { %4323 = vmatpush3.bf16.msra.mxu0 %v4507_v8  ;;  %2267 = vmatprep.mubr.bf16.mxu0 %v3785_v29 }
 0x10b   : > { %4324 = vmatprep.subr.bf16.mxu0 %v4508_v12 }
 0x10c   : > { %2317 = vmatmul.mubr.bf16.vlgmr.msra.gmra.mxu1 %v5052_v17  ;;  %v3790_v17 = vcombine.low %v5210_v5, %v1422_v25  ;;  %v4531_v5 = vld [vmem:[#allocation7 + $0x98] sm:$0xff]  }
 0x10d   : > { %2324 = vmatprep.mubr.bf16.mxu1 %v5163_v27  ;;  %v3793_v27 = vcombine.low %v1422_v25, %v4948_v63 }
 0x10e   : > { %4325 = vmatpush3.bf16.msra.mxu0 %v4508_v12 }
 0x10f   : > { %4326 = vmatprep.subr.bf16.mxu0 %v4509_v23 }
 0x111   : > { %2268 = vmatmul.mubr.bf16.gmra.mxu0 %v3784_v48 }
 0x112   : > { %4327 = vmatpush3.bf16.msra.mxu0 %v4509_v23  ;;  %2275 = vmatprep.mubr.bf16.mxu0 %v3791_v47 }
 0x113   : > { %4328 = vmatprep.subr.bf16.mxu0 %v4510_v28 }
 0x114   : > { %2325 = vmatmul.mubr.bf16.gmra.mxu1 %v5136_v58  ;;  %v3794_v58 = vcombine.low %v1424_v20, %v4951_v1 }
 0x115   : > { %2332 = vmatprep.mubr.bf16.mxu1 %v3787_v3  ;;  %v4535_v3 = vld [vmem:[#allocation7 + $0x90] sm:$0xff]  }
 0x116   : > { %4329 = vmatpush3.bf16.msra.mxu0 %v4510_v28 }
 0x117   : > { %4330 = vmatprep.subr.bf16.mxu0 %v4511_v34 }
 0x119   : > { %2276 = vmatmul.mubr.bf16.gmra.mxu0 %v3790_v17 }
 0x11a   : > { %4331 = vmatpush3.bf16.msra.mxu0 %v4511_v34  ;;  %4334 = vmatprep.mubr.bf16.mxu0 %v5072_v40  ;;  %v4516_v40 = vld [vmem:[#allocation7 + $0x38] sm:$0xff]  }
 0x11b   : > { %4332 = vmatprep.subr.bf16.mxu0 %v4512_v14  ;;  %4147 = vmatpush3.bf16.msra.mxu1 %v4516_v40 }
 0x11c   : > { %2333 = vmatmul.mubr.bf16.gmra.mxu1 %v5215_v0  ;;  %4148 = vmatprep.subr.bf16.mxu1 %v4518_v45  ;;  %v4532_v0 = vld [vmem:[#allocation7 + $0x18] sm:$0xff]  }
 0x11d   : > { %2340 = vmatprep.mubr.bf16.mxu1 %v3793_v27 }
 0x11e   : > { %4333 = vmatpush3.bf16.msra.mxu0 %v4512_v14 }
 0x11f   : > { %4186 = vmatprep.subr.bf16.mxu0 %v4513_v39  ;;  %4149 = vmatpush3.bf16.msra.mxu1 %v4520_v49 }
 0x120   : > { %4150 = vmatprep.subr.bf16.mxu1 %v4522_v55 }
 0x121   : > { %4335 = vmatmul.mubr.bf16.vlgmr.msra.gmra.mxu0 %v5156_v19  ;;  %v4521_v19 = vld [vmem:[#allocation7 + $0xe8] sm:$0xff]  }
 0x122   : > { %4338 = vmatprep.mubr.bf16.mxu0 %v3788_v37  ;;  %4187 = vmatpush3.bf16.msra.mxu0 %v4515_v41 }
 0x123   : > { %4188 = vmatprep.subr.bf16.mxu0 %v4517_v44  ;;  %4151 = vmatpush3.bf16.msra.mxu1 %v4524_v30 }
 0x124   : > { %2341 = vmatmul.mubr.bf16.gmra.mxu1 %v3792_v36  ;;  %4152 = vmatprep.subr.bf16.mxu1 %v4526_v59 }
 0x126   : > { %4189 = vmatpush3.bf16.msra.mxu0 %v4519_v46 }
 0x127   : > { %4190 = vmatprep.subr.bf16.mxu0 %v4521_v19  ;;  %4153 = vmatpush3.bf16.msra.mxu1 %v4528_v60 }
 0x128   : > { %4154 = vmatprep.subr.bf16.mxu1 %v4530_v62 }
 0x129   : > { %4339 = vmatmul.mubr.bf16.gmra.mxu0 %v3794_v58 }
 0x12a   : > { %4191 = vmatpush3.bf16.msra.mxu0 %v4523_v54 }
 0x12b   : > { %4192 = vmatprep.subr.bf16.mxu0 %v4525_v56  ;;  %4155 = vmatpush3.bf16.msra.mxu1 %v4532_v0 }
 0x12c   : > { %4156 = vmatprep.subr.bf16.mxu1 %v4534_v4 }
 0x12e   : > { %4193 = vmatpush3.bf16.msra.mxu0 %v4527_v57 }
 0x12f   : > { %4194 = vmatprep.subr.bf16.mxu0 %v4529_v43  ;;  %4157 = vmatpush3.bf16.msra.mxu1 %v4536_v21 }
 0x130   : > { %4158 = vmatprep.subr.bf16.mxu1 %v4538_v18 }
 0x132   : > { %4195 = vmatpush3.bf16.msra.mxu0 %v4531_v5 }
 0x133   : > { %4196 = vmatprep.subr.bf16.mxu0 %v4533_v2  ;;  %4159 = vmatpush3.bf16.msra.mxu1 %v4540_v10 }
 0x134   : > { %4160 = vmatprep.subr.bf16.mxu1 %v4542_v9 }
 0x136   : > { %4197 = vmatpush3.bf16.msra.mxu0 %v4535_v3 }
 0x137   : > { %4198 = vmatprep.subr.bf16.mxu0 %v4537_v6  ;;  %4161 = vmatpush3.bf16.msra.mxu1 %v4544_v53  ;;  %v3767_v6 = vld [vmem:[%s5587_s2] ss:$0 sm:$0xff] }
 0x138   : > { %4226 = vmatprep.subr.bf16.mxu1 %v4546_v50 }
 0x13a   : > { %4199 = vmatpush3.bf16.msra.mxu0 %v4539_v16 }
 0x13b   : > { %4200 = vmatprep.subr.bf16.mxu0 %v4541_v24 }
 0x13e   : > { %4201 = vmatpush3.bf16.msra.mxu0 %v4543_v31 }
 0x13f   : > { %4266 = vmatprep.subr.bf16.mxu0 %v4545_v7 }
 0x155   : > { %v4030_v26 = vpop.f32.mrf.mxu1 }
 0x157   : > { %v4031_v8 = vpop.f32.mrf.mxu1 }
 0x158   : > { %v4032_v7 = vadd.f32 %v4031_v8, %v4030_v26 }
 0x159   : > { %v5256_v22 = vpop.f32.mrf.mxu1 }
 0x15a   : > { %v3990_v61 = vpop.f32.mrf.mxu0 }
 0x15b   : > { %v5258_v12 = vpop.f32.mrf.mxu1 }
 0x15c   : > { %v3991_v51 = vpop.f32.mrf.mxu0  ;;  %v4035_v26 = vadd.f32 %v5258_v12, %v5256_v22 }
 0x15d   : > { %v3992_v4 = vadd.f32 %v3991_v51, %v3990_v61 }
 0x15e   : > { %v3993_v37 = vpop.f32.mrf.mxu0 }
 0x15f   : > { %v2124_v53 = vadd.f32 %v3992_v4, %v3767_v6 }
 0x160   : > { %v3994_v35 = vpop.f32.mrf.mxu0 }
 0x172   : > { %v3996_v52 = vpop.f32.mrf.mxu0 }
 0x174   : > { %v3997_v29 = vpop.f32.mrf.mxu0 }
 0x175   : > { %v3998_v0 = vadd.f32 %v3997_v29, %v3996_v52  ;;  %v3995_v52 = vadd.f32 %v3994_v35, %v3993_v37 }
 0x176   : > { %v3999_v13 = vpop.f32.mrf.mxu0 }
 0x177   : > { %v2132_v10 = vadd.f32 %v3998_v0, %v3767_v6 }
 0x178   : > { %v4000_v23 = vpop.f32.mrf.mxu0 }
 0x179   : > { %v4001_v16 = vadd.f32 %v4000_v23, %v3999_v13  ;;  %v2189_v23 = vadd.f32 %v4032_v7, %v2124_v53 }
 0x17b   : > { %v2135_v29 = vadd.f32 %v4001_v16, %v3767_v6 }
 0x17c   : > { %v4036_v20 = vpop.f32.mrf.mxu1 }
 0x17e   : > { %v4037_v48 = vpop.f32.mrf.mxu1 }
 0x17f   : > { %v4038_v24 = vadd.f32 %v4037_v48, %v4036_v20 }
 0x180   : > { %v4039_v32 = vpop.f32.mrf.mxu1 }
 0x181   : > { %v2197_v51 = vadd.f32 %v4038_v24, %v2132_v10 }
 0x182   : > { %v4040_v28 = vpop.f32.mrf.mxu1 }
 0x183   : > { %v4041_v63 = vadd.f32 %v4040_v28, %v4039_v32 }
 0x185   : > { %v2200_v8 = vadd.f32 %v4041_v63, %v2135_v29 }
 0x195   : > { %v4002_v38 = vpop.f32.mrf.mxu0 }
 0x197   : > { %v4003_v47 = vpop.f32.mrf.mxu0 }
 0x198   : > { %v4004_v1 = vadd.f32 %v4003_v47, %v4002_v38 }
 0x199   : > { %v4005_v25 = vpop.f32.mrf.mxu0 }
 0x19a   : > { %v2140_v32 = vadd.f32 %v4004_v1, %v3767_v6 }
 0x19b   : > { %v4006_v17 = vpop.f32.mrf.mxu0 }
 0x19c   : > { %v4007_v37 = vadd.f32 %v4006_v17, %v4005_v25 }
 0x19e   : > { %v2143_v10 = vadd.f32 %v4007_v37, %v3767_v6 }
 0x1a1   : > { %v4042_v34 = vpop.f32.mrf.mxu1 }
 0x1a3   : > { %v4043_v14 = vpop.f32.mrf.mxu1 }
 0x1a4   : > { %v4044_v28 = vadd.f32 %v4043_v14, %v4042_v34 }
 0x1a5   : > { %v5260_v58 = vpop.f32.mrf.mxu1 }
 0x1a6   : > { %v2205_v25 = vadd.f32 %v4044_v28, %v2140_v32 }
 0x1a7   : > { %v5262_v42 = vpop.f32.mrf.mxu1 }
 0x1b9   : > { %v4008_v27 = vpop.f32.mrf.mxu0 }
 0x1bb   : > { %v4009_v36 = vpop.f32.mrf.mxu0 }
 0x1bd   : > { %v4011_v39 = vpop.f32.mrf.mxu0 }
 0x1bf   : > { %v4012_v41 = vpop.f32.mrf.mxu0 }
 0x1c1   : > { %v4070_v40 = vpop.f32.mrf.mxu0 }
 0x1c3   : > { %v4071_v44 = vpop.f32.mrf.mxu0 }
 0x1c4   : > { %v4048_v46 = vpop.f32.mrf.mxu1  ;;  %v4072_v15 = vadd.f32 %v4071_v44, %v4070_v40 }
 0x1c5   : > { %v4073_v45 = vpop.f32.mrf.mxu0 }
 0x1c6   : > { %v4049_v49 = vpop.f32.mrf.mxu1 }
 0x1c7   : > { %v4074_v19 = vpop.f32.mrf.mxu0 }
 0x1c8   : > { %v5264_v54 = vpop.f32.mrf.mxu1  ;;  %v4075_v44 = vadd.f32 %v4074_v19, %v4073_v45 }
 0x1c9   : > { %5630 = vst [vmem:[#allocation17_spill] sm:$0xff] %v5264_v54  ;;  %v4076_v55 = vpop.f32.mrf.mxu0  ;;  %v2127_v54 = vadd.f32 %v3995_v52, %v3767_v6 }
 0x1ca   : > { %v5266_v30 = vpop.f32.mrf.mxu1 }
 0x1cb   : > { %5631 = vst [vmem:[#allocation18_spill] sm:$0xff] %v5266_v30  ;;  %v4077_v56 = vpop.f32.mrf.mxu0  ;;  %v4010_v30 = vadd.f32 %v4009_v36, %v4008_v27  ;;  %v4050_v27 = vadd.f32 %v4049_v49, %v4048_v46  ;;  %v4013_v36 = vadd.f32 %v4012_v41, %v4011_v39  ;;  %v2192_v16 = vadd.f32 %v4035_v26, %v2127_v54 }
 0x1cc   : > { %v4110_v57 = vpop.f32.mrf.mxu1  ;;  %v4078_v50 = vadd.f32 %v4077_v56, %v4076_v55  ;;  %v2254_v55 = vadd.f32 %v4072_v15, %v2189_v23  ;;  %v4047_v15 = vadd.f32 %v5262_v42, %v5260_v58 }
 0x1cd   : > { %v4079_v59 = vpop.f32.mrf.mxu0  ;;  %v2148_v40 = vadd.f32 %v4010_v30, %v3767_v6  ;;  %v2151_v39 = vadd.f32 %v4013_v36, %v3767_v6  ;;  %v2257_v41 = vadd.f32 %v4075_v44, %v2192_v16 }
 0x1ce   : > { %v4111_v60 = vpop.f32.mrf.mxu1 }
 0x1cf   : > { %v4080_v43 = vpop.f32.mrf.mxu0  ;;  %v4112_v38 = vadd.f32 %v4111_v60, %v4110_v57  ;;  %v2213_v14 = vadd.f32 %v4050_v27, %v2148_v40 }
 0x1d0   : > { %v5268_v5 = vpop.f32.mrf.mxu1  ;;  %v4081_v20 = vadd.f32 %v4080_v43, %v4079_v59 }
 0x1d1   : > { %v4082_v62 = vpop.f32.mrf.mxu0  ;;  %v2319_v17 = vadd.f32 %v4112_v38, %v2254_v55 }
 0x1d2   : > { %v4114_v2 = vpop.f32.mrf.mxu1  ;;  %v2265_v4 = vadd.f32 %v4081_v20, %v2200_v8  ;;  %v5634_v45 = vld [vmem:[#allocation18_spill] sm:$0xff] }
 0x1d3   : > { %v4083_v3 = vpop.f32.mrf.mxu0  ;;  %v4115_v46 = vadd.f32 %v4114_v2, %v5268_v5  ;;  %v2208_v5 = vadd.f32 %v4047_v15, %v2143_v10 }
 0x1d4   : > { %v4116_v21 = vpop.f32.mrf.mxu1  ;;  %v4084_v22 = vadd.f32 %v4083_v3, %v4082_v62 }
 0x1d5   : > { %v5273_v18 = vpop.f32.mrf.mxu0 }
 0x1d6   : > { %5632 = vst [vmem:[#allocation19_spill] sm:$0xff] %v5273_v18  ;;  %v4117_v31 = vpop.f32.mrf.mxu1  ;;  %v2262_v18 = vadd.f32 %v4078_v50, %v2197_v51  ;;  %v2270_v60 = vadd.f32 %v4084_v22, %v2205_v25  ;;  %v2322_v50 = vadd.f32 %v4115_v46, %v2257_v41 }
 0x1d7   : > { %v4086_v9 = vpop.f32.mrf.mxu0  ;;  %v4118_v0 = vadd.f32 %v4117_v31, %v4116_v21 }
 0x1d8   : > { %v4119_v33 = vpop.f32.mrf.mxu1 }
 0x1d9   : > { %v4088_v61 = vpop.f32.mrf.mxu0  ;;  %v2327_v21 = vadd.f32 %v4118_v0, %v2262_v18 }
 0x1da   : > { %v4120_v11 = vpop.f32.mrf.mxu1 }
 0x1db   : > { %v4089_v13 = vpop.f32.mrf.mxu0  ;;  %v4121_v59 = vadd.f32 %v4120_v11, %v4119_v33  ;;  %v5633_v33 = vld [vmem:[#allocation17_spill] sm:$0xff] }
 0x1dc   : > { %v4122_v48 = vpop.f32.mrf.mxu1  ;;  %v4090_v63 = vadd.f32 %v4089_v13, %v4088_v61  ;;  %v4053_v49 = vadd.f32 %v5634_v45, %v5633_v33 }
 0x1dd   : > { %v4091_v35 = vpop.f32.mrf.mxu0  ;;  %v2330_v57 = vadd.f32 %v4121_v59, %v2265_v4  ;;  %v5635_v3 = vld [vmem:[#allocation19_spill] sm:$0xff] }
 0x1de   : > { %v4123_v47 = vpop.f32.mrf.mxu1  ;;  %v4087_v58 = vadd.f32 %v4086_v9, %v5635_v3  ;;  %v2278_v42 = vadd.f32 %v4090_v63, %v2213_v14  ;;  %v2216_v29 = vadd.f32 %v4053_v49, %v2151_v39 }
 0x1df   : > { %v4092_v56 = vpop.f32.mrf.mxu0  ;;  %v4124_v62 = vadd.f32 %v4123_v47, %v4122_v48 }
 0x1e0   : > { %v4125_v43 = vpop.f32.mrf.mxu1  ;;  %v4093_v31 = vadd.f32 %v4092_v56, %v4091_v35  ;;  %v2273_v0 = vadd.f32 %v4087_v58, %v2208_v5 }
 0x1e1   : > { %v4336_v12 = vpop.f32.mrf.mxu0  ;;  %v2335_v26 = vadd.f32 %v4124_v62, %v2270_v60 }
 0x1e2   : > { %v4126_v1 = vpop.f32.mrf.mxu1  ;;  %v2392_v34 = vadd.f32 %v4336_v12, %v2327_v21  ;;  %v2281_v37 = vadd.f32 %v4093_v31, %v2216_v29 }
 0x1e3   : > { %v2383_v11 = vpop.f32.mrf.mxu0  ;;  %v4127_v8 = vadd.f32 %v4126_v1, %v4125_v43 }
 0x1e4   : > { %v4128_v19 = vpop.f32.mrf.mxu1  ;;  %v2416_v54 = vmax.f32 %v2392_v34, 0.0  ;;  %v2384_v30 = vadd.f32 %v2383_v11, %v2319_v17 }
 0x1e5   : > { %v4337_v18 = vpop.f32.mrf.mxu0  ;;  %v2338_v34 = vadd.f32 %v4127_v8, %v2273_v0 }
 0x1e6   : > { %v4129_v24 = vpop.f32.mrf.mxu1  ;;  %v2424_v6 = vpack.c.bf16 %v2416_v54, %v2416_v54  ;;  %v2414_v53 = vmax.f32 %v2384_v30, 0.0  ;;  %v2395_v7 = vadd.f32 %v4337_v18, %v2330_v57 }
 0x1e7   : > { %v4130_v2 = vadd.f32 %v4129_v24, %v4128_v19  ;;  %v2386_v52 = vpop.f32.mrf.mxu0 }
 0x1e8   : > { %v4131_v61 = vpop.f32.mrf.mxu1  ;;  %v2445_v51 = vshrl.u32 %v2424_v6, 16  ;;  %v2422_v13 = vpack.c.bf16 %v2414_v53, %v2414_v53  ;;  %v2417_v23 = vmax.f32 %v2395_v7, 0.0  ;;  %v2387_v20 = vadd.f32 %v2386_v52, %v2322_v50 }
 0x1e9   : > { %v2343_v48 = vadd.f32 %v4130_v2, %v2278_v42  ;;  %v4340_v9 = vpop.f32.mrf.mxu0  ;;  %v2448_v4 = vshll.u32 %v2424_v6, 16 }
 0x1ea   : > { %v4132_v35 = vpop.f32.mrf.mxu1  ;;  %v2431_v32 = vshrl.u32 %v2422_v13, 16  ;;  %v2425_v28 = vpack.c.bf16 %v2417_v23, %v2417_v23  ;;  %v2447_v38 = vrot.slane %v2445_v51, 7  ;;  %v2415_v47 = vmax.f32 %v2387_v20, 0.0 }
 0x1eb   : > { %v4133_v55 = vadd.f32 %v4132_v35, %v4131_v61  ;;  %v2408_v40 = vadd.f32 %v4340_v9, %v2343_v48  ;;  %v2399_v27 = vpop.f32.mrf.mxu0  ;;  %v2434_v44 = vshll.u32 %v2422_v13, 16  ;;  %v4547_v13 = vld [vmem:[#allocation7 + $0x1b8] sm:$0xff]   ;;  %v5638_v48 = vld [vmem:[#allocation16_spill] sm:$0xff] }
 0x1ec   : > { %v2433_v36 = vrot.slane %v2431_v32, 7  ;;  %v2452_v56 = vshrl.u32 %v2425_v28, 16  ;;  %v2423_v59 = vpack.c.bf16 %v2415_v47, %v2415_v47  ;;  %v2400_v16 = vadd.f32 %v2399_v27, %v2335_v26  ;;  %v4549_v26 = vld [vmem:[#allocation7 + $0x1f0] sm:$0xff]  }
 0x1ed   : > { %v2420_v21 = vmax.f32 %v2408_v40, 0.0  ;;  %v4341_v10 = vpop.f32.mrf.mxu0  ;;  %v2455_v43 = vshll.u32 %v2425_v28, 16  ;;  %v2346_v12 = vadd.f32 %v4133_v55, %v2281_v37  ;;  %v2450_v25 = vor.u32 %v2448_v4, %v2447_v38 }
 0x1ee   : > { %v2436_v22 = vor.u32 %v2434_v44, %v2433_v36  ;;  %v2454_v63 = vrot.slane %v2452_v56, 7  ;;  %v2438_v15 = vshrl.u32 %v2423_v59, 16  ;;  %v2418_v46 = vmax.f32 %v2400_v16, 0.0  ;;  %v4551_v56 = vld [vmem:[#allocation7 + $0x1b0] sm:$0xff]  }
 0x1ef   : > { %v2428_v1 = vpack.c.bf16 %v2420_v21, %v2420_v21  ;;  %v2402_v17 = vpop.f32.mrf.mxu0  ;;  %v2411_v11 = vadd.f32 %v4341_v10, %v2346_v12  ;;  %v2441_v19 = vshll.u32 %v2423_v59, 16  ;;  %v2496_v31 = vsel %vm4919_vm3, 0, %v2450_v25  ;;  %v4553_v10 = vld [vmem:[#allocation7 + $0x1e8] sm:$0xff]   ;;  %v5640_v25 = vld [vmem:[#allocation14_spill] sm:$0xff] }
 0x1f0   : > { %v2494_v39 = vsel %vm4919_vm3, 0, %v2436_v22  ;;  %v2457_v41 = vor.u32 %v2455_v43, %v2454_v63  ;;  %v2440_v49 = vrot.slane %v2438_v15, 7  ;;  %v2426_v57 = vpack.c.bf16 %v2418_v46, %v2418_v46  ;;  %v5639_v43 = vld [vmem:[#allocation15_spill] sm:$0xff] }
 0x1f1   : > { %v5287_v45 = vsel %vm4924_vm5, %v2494_v39, 0  ;;  %v2473_v54 = vshrl.u32 %v2428_v1, 16  ;;  %v2421_v60 = vmax.f32 %v2411_v11, 0.0  ;;  %v2403_v62 = vadd.f32 %v2402_v17, %v2338_v34 }
 0x1f2   : > { %v2497_v30 = vsel %vm4919_vm3, 0, %v2457_v41  ;;  %v2443_v3 = vor.u32 %v2441_v19, %v2440_v49  ;;  %v2459_v58 = vshrl.u32 %v2426_v57, 16  ;;  %v2566_v24 = vrot.slane %v5287_v45, 1  ;;  %v4550_v41 = vld [vmem:[#allocation7 + $0x170] sm:$0xff]  }
 0x1f3   : > { %v2429_v42 = vpack.c.bf16 %v2421_v60, %v2421_v60  ;;  %v2419_v18 = vmax.f32 %v2403_v62, 0.0  ;;  %v5296_v6 = vsel %vm4924_vm5, %v2497_v30, 0  ;;  %v2475_v5 = vrot.slane %v2473_v54, 7  ;;  %v4555_v54 = vld [vmem:[#allocation7 + $0x1a8] sm:$0xff]  }
 0x1f4   : > { %v2495_v53 = vsel %vm4919_vm3, 0, %v2443_v3  ;;  %v2461_v2 = vrot.slane %v2459_v58, 7  ;;  %v2462_v50 = vshll.u32 %v2426_v57, 16  ;;  %v2513_v51 = vshll.u32 %v5287_v45, 16  ;;  %v4557_v58 = vld [vmem:[#allocation7 + $0x1e0] sm:$0xff]  }
 0x1f5   : > { %v5302_v7 = vsel %vm4924_vm5, %v2495_v53, 0  ;;  %v2480_v52 = vshrl.u32 %v2429_v42, 16  ;;  %v2427_v29 = vpack.c.bf16 %v2419_v18, %v2419_v18  ;;  %v5309_v23 = vsel %vm4924_vm5, %v2496_v31, 0 }
 0x1f6   : > { %v3871_v61 = vcombine.low %v5287_v45, %v5302_v7  ;;  %v2476_v0 = vshll.u32 %v2428_v1, 16  ;;  %v2464_v20 = vor.u32 %v2462_v50, %v2461_v2  ;;  %v3870_v9 = vcombine.low %v5638_v48, %v2566_v24  ;;  %v4548_v1 = vld [vmem:[#allocation7 + $0x138] sm:$0xff]   ;;  %v4554_v2 = vld [vmem:[#allocation7 + $0x168] sm:$0xff]  }
 0x1f7   : > { %v2466_v8 = vshrl.u32 %v2427_v29, 16  ;;  %v2511_v37 = vshrl.u32 %v5287_v45, 16  ;;  %v2515_v35 = vrot.slane %v2513_v51, 1  ;;  %v3877_v32 = vcombine.low %v5309_v23, %v5296_v6  ;;  %v4559_v51 = vld [vmem:[#allocation7 + $0x1a0] sm:$0xff]  }
 0x1f8   : > { %3340 = vmatprep.mubr.bf16.mxu0 %v3871_v61  ;;  %v2478_v28 = vor.u32 %v2476_v0, %v2475_v5  ;;  %v2498_v55 = vsel %vm4919_vm3, 0, %v2464_v20  ;;  %v2483_v38 = vshll.u32 %v2429_v42, 16  ;;  %v2520_v47 = vshll.u32 %v5302_v7, 16  ;;  %v4552_v42 = vld [vmem:[#allocation7 + $0x130] sm:$0xff]  }
 0x1f9   : > { %3341 = vmatmul.mubr.bf16.vlgmr.msra.gmra.mxu0 %v3870_v9  ;;  %v2482_v40 = vrot.slane %v2480_v52, 7  ;;  %v2468_v27 = vrot.slane %v2466_v8, 7  ;;  %v2469_v36 = vshll.u32 %v2427_v29, 16  ;;  %v5320_v44 = vor.u32 %v2515_v35, %v2511_v37  ;;  %v4561_v9 = vld [vmem:[#allocation7 + $0x1d8] sm:$0xff]  }
 0x1fa   : > { %3348 = vmatprep.mubr.bf16.mxu0 %v3877_v32  ;;  %4267 = vmatpush3.bf16.msra.mxu0 %v4547_v13  ;;  %v2518_v4 = vshrl.u32 %v5302_v7, 16  ;;  %v2522_v59 = vrot.slane %v2520_v47, 1  ;;  %v2527_v21 = vshll.u32 %v5309_v23, 16  ;;  %v2567_v16 = vrot.slane %v5302_v7, 1  ;;  %v4558_v32 = vld [vmem:[#allocation7 + $0x160] sm:$0xff]  }
 0x1fb   : > { %4268 = vmatprep.subr.bf16.mxu0 %v4549_v26  ;;  %v5327_v22 = vsel %vm4924_vm5, %v2498_v55, 0  ;;  %v2471_v63 = vor.u32 %v2469_v36, %v2468_v27  ;;  %v3869_v12 = vcombine.low %v5639_v43, %v5320_v44  ;;  %v3868_v15 = vcombine.low %v5640_v25, %v5287_v45  ;;  %v4556_v26 = vld [vmem:[#allocation7 + $0x128] sm:$0xff]   ;;  %v4560_v27 = vld [vmem:[#allocation7 + $0x120] sm:$0xff]  }
 0x1fc   : > { %v5333_v34 = vor.u32 %v2522_v59, %v2518_v4  ;;  %v2525_v17 = vshrl.u32 %v5309_v23, 16  ;;  %v2529_v39 = vrot.slane %v2527_v21, 1  ;;  %v2568_v46 = vrot.slane %v5309_v23, 1  ;;  %v4562_v59 = vld [vmem:[#allocation7 + $0x158] sm:$0xff]  }
 0x1fd   : > { %v2500_v11 = vsel %vm4919_vm3, 0, %v2478_v28  ;;  %v2485_v49 = vor.u32 %v2483_v38, %v2482_v40  ;;  %v2499_v19 = vsel %vm4919_vm3, 0, %v2471_v63  ;;  %3275 = vmatprep.mubr.bf16.mxu1 %v3869_v12  ;;  %v2534_v30 = vshll.u32 %v5296_v6, 16  ;;  %v4563_v38 = vld [vmem:[#allocation7 + $0x198] sm:$0xff]   ;;  %v4565_v40 = vld [vmem:[#allocation7 + $0x1d0] sm:$0xff]  }
 0x1fe   : > { %4269 = vmatpush3.bf16.msra.mxu0 %v4551_v56  ;;  %v5344_v57 = vsel %vm4924_vm5, %v2499_v19, 0  ;;  %3276 = vmatmul.mubr.bf16.vlgmr.msra.gmra.mxu1 %v3868_v15  ;;  %v5346_v60 = vor.u32 %v2529_v39, %v2525_v17  ;;  %v5352_v62 = vcombine.low %v2567_v16, %v2568_v46  ;;  %v2541_v3 = vshll.u32 %v5327_v22, 16  ;;  %v4567_v63 = vld [vmem:[#allocation7 + $0x190] sm:$0xff]   ;;  %v4569_v15 = vld [vmem:[#allocation7 + $0x1c8] sm:$0xff]  }
 0x1ff   : > { %4270 = vmatprep.subr.bf16.mxu0 %v4553_v10  ;;  %4227 = vmatpush3.bf16.msra.mxu1 %v4548_v1  ;;  %v3883_v18 = vcombine.low %v5327_v22, %v5344_v57  ;;  %v2536_v31 = vrot.slane %v2534_v30, 1  ;;  %v5359_v53 = vsel %vm4924_vm5, %v2500_v11, 0  ;;  %v2539_v50 = vshrl.u32 %v5327_v22, 16  ;;  %v4564_v1 = vld [vmem:[#allocation7 + $0x118] sm:$0xff]   ;;  %v4571_v19 = vld [vmem:[#allocation7 + $0x188] sm:$0xff]   ;;  %v4573_v30 = vld [vmem:[#allocation7 + $0x1c0] sm:$0xff]  }
 0x200   : > { %v5363_v5 = vcombine.low %v5333_v34, %v5346_v60  ;;  %4228 = vmatprep.subr.bf16.mxu1 %v4550_v41  ;;  %v2543_v52 = vrot.slane %v2541_v3, 1  ;;  %v2501_v29 = vsel %vm4919_vm3, 0, %v2485_v49  ;;  %v2532_v61 = vshrl.u32 %v5296_v6, 16  ;;  %v4566_v41 = vld [vmem:[#allocation7 + $0x150] sm:$0xff]  }
 0x201   : > { %3349 = vmatmul.mubr.bf16.gmra.mxu0 %v5352_v62  ;;  %v2548_v13 = vshll.u32 %v5344_v57, 16  ;;  %v2570_v20 = vrot.slane %v5327_v22, 1  ;;  %v2555_v14 = vshll.u32 %v5359_v53, 16  ;;  %v5380_v37 = vsel %vm4924_vm5, %v2501_v29, 0  ;;  %v4568_v3 = vld [vmem:[#allocation7 + $0x110] sm:$0xff]  }
 0x202   : > { %3356 = vmatprep.mubr.bf16.mxu0 %v3883_v18  ;;  %4271 = vmatpush3.bf16.msra.mxu0 %v4555_v54  ;;  %v5372_v0 = vor.u32 %v2543_v52, %v2539_v50  ;;  %v5375_v8 = vor.u32 %v2536_v31, %v2532_v61  ;;  %v5384_v35 = vcombine.low %v5302_v7, %v5309_v23  ;;  %v2569_v28 = vrot.slane %v5296_v6, 1  ;;  %v4572_v18 = vld [vmem:[#allocation7 + $0x108] sm:$0xff]   ;;  %v4576_v52 = vld [vmem:[#allocation7 + $0x100] sm:$0xff]   ;;  %v4578_v7 = vld [vmem:[#allocation7 + $0x230] sm:$0xff]  }
 0x203   : > { %3283 = vmatprep.mubr.bf16.mxu1 %v5363_v5  ;;  %4272 = vmatprep.subr.bf16.mxu0 %v4557_v58  ;;  %v2550_v47 = vrot.slane %v2548_v13, 1  ;;  %v3889_v36 = vcombine.low %v5359_v53, %v5380_v37  ;;  %v2546_v56 = vshrl.u32 %v5344_v57, 16  ;;  %v2557_v4 = vrot.slane %v2555_v14, 1  ;;  %v4570_v58 = vld [vmem:[#allocation7 + $0x148] sm:$0xff]  }
 0x204   : > { %4229 = vmatpush3.bf16.msra.mxu1 %v4552_v42  ;;  %v3881_v55 = vcombine.low %v5375_v8, %v5372_v0  ;;  %v5394_v33 = vcombine.low %v2569_v28, %v2570_v20  ;;  %v2553_v10 = vshrl.u32 %v5359_v53, 16  ;;  %v2571_v12 = vrot.slane %v5344_v57, 1  ;;  %v4575_v42 = vld [vmem:[#allocation7 + $0x180] sm:$0xff]  }
 0x205   : > { %4230 = vmatprep.subr.bf16.mxu1 %v4554_v2  ;;  %v5400_v21 = vor.u32 %v2550_v47, %v2546_v56  ;;  %v3880_v39 = vcombine.low %v5296_v6, %v5327_v22  ;;  %v2572_v11 = vrot.slane %v5359_v53, 1  ;;  %v3886_v31 = vcombine.low %v5344_v57, %v5359_v53  ;;  %v4574_v2 = vld [vmem:[#allocation7 + $0x140] sm:$0xff]  }
 0x206   : > { %4273 = vmatpush3.bf16.msra.mxu0 %v4559_v51  ;;  %3284 = vmatmul.mubr.bf16.gmra.mxu1 %v5384_v35  ;;  %v5404_v17 = vor.u32 %v2557_v4, %v2553_v10  ;;  %v3873_v50 = vcombine.low %v2566_v24, %v2567_v16  ;;  %v2576_v29 = vshll.u32 %v5380_v37, 16  ;;  %v3872_v57 = vcombine.low %v5320_v44, %v5333_v34  ;;  %v4579_v16 = vld [vmem:[#allocation7 + $0x228] sm:$0xff]   ;;  %v4580_v6 = vld [vmem:[#allocation7 + $0x220] sm:$0xff]  }
 0x207   : > { %4274 = vmatprep.subr.bf16.mxu0 %v4561_v9  ;;  %3291 = vmatprep.mubr.bf16.mxu1 %v3881_v55  ;;  %v5413_v54 = vcombine.low %v2571_v12, %v2572_v11  ;;  %v3879_v45 = vcombine.low %v2568_v46, %v2569_v28  ;;  %v2574_v61 = vshrl.u32 %v5380_v37, 16  ;;  %v3878_v44 = vcombine.low %v5346_v60, %v5375_v8  ;;  %v4581_v46 = vld [vmem:[#allocation7 + $0x218] sm:$0xff]   ;;  %v4582_v9 = vld [vmem:[#allocation7 + $0x210] sm:$0xff]   ;;  %v4584_v8 = vld [vmem:[#allocation7 + $0x200] sm:$0xff]  }
 0x208   : > { %4231 = vmatpush3.bf16.msra.mxu1 %v4556_v26  ;;  %v3887_v49 = vcombine.low %v5400_v21, %v5404_v17  ;;  %v2578_v24 = vrot.slane %v2576_v29, 1  ;;  %v3885_v23 = vcombine.low %v2570_v20, %v2571_v12  ;;  %v2581_v13 = vrot.slane %v5380_v37, 1 }
 0x209   : > { %4232 = vmatprep.subr.bf16.mxu1 %v4558_v32  ;;  %3357 = vmatmul.mubr.bf16.gmra.mxu0 %v5394_v33  ;;  %v3884_v60 = vcombine.low %v5372_v0, %v5400_v21  ;;  %v3892_v20 = vcombine.low %v5380_v37, %v5640_v25 }
 0x20a   : > { %3364 = vmatprep.mubr.bf16.mxu0 %v3889_v36  ;;  %4275 = vmatpush3.bf16.msra.mxu0 %v4563_v38  ;;  %v2579_v51 = vor.u32 %v2578_v24, %v2574_v61  ;;  %v3891_v22 = vcombine.low %v2572_v11, %v2581_v13  ;;  %v3894_v25 = vcombine.low %v2581_v13, %v5638_v48  ;;  %v3867_v13 = vld [vmem:[%s5589_s4] ss:$0 sm:$0xff] }
 0x20b   : > { %4276 = vmatprep.subr.bf16.mxu0 %v4565_v40 }
 0x20c   : > { %4233 = vmatpush3.bf16.msra.mxu1 %v4560_v27  ;;  %v3893_v34 = vcombine.low %v2579_v51, %v5639_v43  ;;  %v4583_v43 = vld [vmem:[#allocation7 + $0x208] sm:$0xff]   ;;  %v3890_v26 = vcombine.low %v5404_v17, %v2579_v51 }
 0x20d   : > { %4234 = vmatprep.subr.bf16.mxu1 %v4562_v59 }
 0x20e   : > { %4277 = vmatpush3.bf16.msra.mxu0 %v4567_v63  ;;  %3292 = vmatmul.mubr.bf16.gmra.mxu1 %v3880_v39 }
 0x20f   : > { %4278 = vmatprep.subr.bf16.mxu0 %v4569_v15  ;;  %3299 = vmatprep.mubr.bf16.mxu1 %v3887_v49 }
 0x210   : > { %4235 = vmatpush3.bf16.msra.mxu1 %v4564_v1 }
 0x211   : > { %4236 = vmatprep.subr.bf16.mxu1 %v4566_v41  ;;  %3365 = vmatmul.mubr.bf16.gmra.mxu0 %v5413_v54 }
 0x212   : > { %4279 = vmatpush3.bf16.msra.mxu0 %v4571_v19  ;;  %3470 = vmatprep.mubr.bf16.mxu0 %v5363_v5  ;;  %v4577_v5 = vld [vmem:[#allocation7 + $0x238] sm:$0xff]  }
 0x213   : > { %4280 = vmatprep.subr.bf16.mxu0 %v4573_v30 }
 0x214   : > { %4237 = vmatpush3.bf16.msra.mxu1 %v4568_v3 }
 0x215   : > { %4238 = vmatprep.subr.bf16.mxu1 %v4570_v58 }
 0x216   : > { %4281 = vmatpush3.bf16.msra.mxu0 %v4575_v42  ;;  %3300 = vmatmul.mubr.bf16.gmra.mxu1 %v3886_v31 }
 0x217   : > { %3405 = vmatprep.mubr.bf16.mxu1 %v3873_v50 }
 0x218   : > { %4239 = vmatpush3.bf16.msra.mxu1 %v4572_v18 }
 0x219   : > { %4240 = vmatprep.subr.bf16.mxu1 %v4574_v2  ;;  %3471 = vmatmul.mubr.bf16.vlgmr.msra.gmra.mxu0 %v5384_v35 }
 0x21a   : > { %3478 = vmatprep.mubr.bf16.mxu0 %v3881_v55 }
 0x21c   : > { %4241 = vmatpush3.bf16.msra.mxu1 %v4576_v52 }
 0x21d   : > { %4342 = vmatprep.subr.bf16.mxu1 %v4577_v5 }
 0x21f   : > { %3406 = vmatmul.mubr.bf16.vlgmr.msra.gmra.mxu1 %v3872_v57 }
 0x220   : > { %4343 = vmatpush3.bf16.msra.mxu1 %v4577_v5  ;;  %3413 = vmatprep.mubr.bf16.mxu1 %v3879_v45 }
 0x221   : > { %4344 = vmatprep.subr.bf16.mxu1 %v4578_v7  ;;  %3479 = vmatmul.mubr.bf16.gmra.mxu0 %v3880_v39 }
 0x222   : > { %3486 = vmatprep.mubr.bf16.mxu0 %v3887_v49 }
 0x224   : > { %4345 = vmatpush3.bf16.msra.mxu1 %v4578_v7 }
 0x225   : > { %4346 = vmatprep.subr.bf16.mxu1 %v4579_v16 }
 0x227   : > { %3414 = vmatmul.mubr.bf16.gmra.mxu1 %v3878_v44 }
 0x228   : > { %4347 = vmatpush3.bf16.msra.mxu1 %v4579_v16  ;;  %3421 = vmatprep.mubr.bf16.mxu1 %v3885_v23 }
 0x229   : > { %4348 = vmatprep.subr.bf16.mxu1 %v4580_v6  ;;  %3487 = vmatmul.mubr.bf16.gmra.mxu0 %v3886_v31 }
 0x22a   : > { %3494 = vmatprep.mubr.bf16.mxu0 %v3893_v34 }
 0x22c   : > { %4349 = vmatpush3.bf16.msra.mxu1 %v4580_v6 }
 0x22d   : > { %4350 = vmatprep.subr.bf16.mxu1 %v4581_v46 }
 0x22f   : > { %3422 = vmatmul.mubr.bf16.gmra.mxu1 %v3884_v60 }
 0x230   : > { %4351 = vmatpush3.bf16.msra.mxu1 %v4581_v46  ;;  %3429 = vmatprep.mubr.bf16.mxu1 %v3891_v22 }
 0x231   : > { %4352 = vmatprep.subr.bf16.mxu1 %v4582_v9  ;;  %3495 = vmatmul.mubr.bf16.gmra.mxu0 %v3892_v20 }
 0x234   : > { %4353 = vmatpush3.bf16.msra.mxu1 %v4582_v9 }
 0x235   : > { %4354 = vmatprep.subr.bf16.mxu1 %v4583_v43 }
 0x237   : > { %3430 = vmatmul.mubr.bf16.gmra.mxu1 %v3890_v26 }
 0x238   : > { %4355 = vmatpush3.bf16.msra.mxu1 %v4583_v43  ;;  %4358 = vmatprep.mubr.bf16.mxu1 %v5352_v62 }
 0x239   : > { %4356 = vmatprep.subr.bf16.mxu1 %v4584_v8 }
 0x23c   : > { %4357 = vmatpush3.bf16.msra.mxu1 %v4584_v8 }
 0x23f   : > { %4359 = vmatmul.mubr.bf16.vlgmr.msra.gmra.mxu1 %v5394_v33 }
 0x240   : > { %4362 = vmatprep.mubr.bf16.mxu1 %v5413_v54 }
 0x247   : > { %4363 = vmatmul.mubr.bf16.gmra.mxu1 %v3894_v25 }
 0x2b9   : > { %v5449_v53 = vpop.f32.mrf.mxu0 }
 0x2bb   : > { %v5451_v0 = vpop.f32.mrf.mxu0 }
 0x2bd   : > { %v5453_v14 = vpop.f32.mrf.mxu0 }
 0x2be   : > { %v4162_v37 = vpop.f32.mrf.mxu1 }
 0x2bf   : > { %v5455_v35 = vpop.f32.mrf.mxu0 }
 0x2c0   : > { %v4163_v32 = vpop.f32.mrf.mxu1 }
 0x2c1   : > { %v4208_v62 = vpop.f32.mrf.mxu0  ;;  %v4164_v46 = vadd.f32 %v4163_v32, %v4162_v37 }
 0x2c2   : > { %v4165_v28 = vpop.f32.mrf.mxu1 }
 0x2c3   : > { %v4209_v55 = vpop.f32.mrf.mxu0  ;;  %v3278_v8 = vadd.f32 %v4164_v46, %v3867_v13 }
 0x2c4   : > { %v4166_v38 = vpop.f32.mrf.mxu1  ;;  %v4210_v25 = vadd.f32 %v4209_v55, %v4208_v62  ;;  %v4207_v62 = vadd.f32 %v5455_v35, %v5453_v14 }
 0x2c5   : > { %v5457_v47 = vpop.f32.mrf.mxu0  ;;  %v4167_v20 = vadd.f32 %v4166_v38, %v4165_v28 }
 0x2c6   : > { %v4168_v33 = vpop.f32.mrf.mxu1 }
 0x2c7   : > { %v4212_v40 = vpop.f32.mrf.mxu0 }
 0x2c8   : > { %v4169_v48 = vpop.f32.mrf.mxu1 }
 0x2c9   : > { %v5459_v27 = vpop.f32.mrf.mxu0  ;;  %v4170_v6 = vadd.f32 %v4169_v48, %v4168_v33  ;;  %v4204_v33 = vadd.f32 %v5451_v0, %v5449_v53 }
 0x2ca   : > { %v4171_v36 = vpop.f32.mrf.mxu1 }
 0x2cb   : > { %v5461_v56 = vpop.f32.mrf.mxu0  ;;  %v3286_v22 = vadd.f32 %v4170_v6, %v3867_v13 }
 0x2cc   : > { %v4172_v4 = vpop.f32.mrf.mxu1 }
 0x2cd   : > { %v5463_v59 = vpop.f32.mrf.mxu0  ;;  %v4173_v60 = vadd.f32 %v4172_v4, %v4171_v36  ;;  %v3281_v36 = vadd.f32 %v4167_v20, %v3867_v13  ;;  %v4213_v4 = vadd.f32 %v4212_v40, %v5457_v47  ;;  %v4216_v47 = vadd.f32 %v5461_v56, %v5459_v27 }
 0x2ce   : > { %v4174_v21 = vpop.f32.mrf.mxu1 }
 0x2cf   : > { %v5465_v10 = vpop.f32.mrf.mxu0  ;;  %v3289_v48 = vadd.f32 %v4173_v60, %v3867_v13 }
 0x2d0   : > { %5641 = vst [vmem:[#allocation17_spill] sm:$0xff] %v5465_v10  ;;  %v4175_v63 = vpop.f32.mrf.mxu1  ;;  %v3351_v10 = vadd.f32 %v4210_v25, %v3286_v22 }
 0x2d1   : > { %v5467_v12 = vpop.f32.mrf.mxu0  ;;  %v4176_v32 = vadd.f32 %v4175_v63, %v4174_v21  ;;  %v3354_v53 = vadd.f32 %v4213_v4, %v3289_v48 }
 0x2d2   : > { %v5469_v15 = vpop.f32.mrf.mxu1 }
 0x2d3   : > { %v5471_v1 = vpop.f32.mrf.mxu0  ;;  %v3294_v21 = vadd.f32 %v4176_v32, %v3867_v13 }
 0x2d4   : > { %v5473_v17 = vpop.f32.mrf.mxu1  ;;  %v4222_v14 = vadd.f32 %v5471_v1, %v5467_v12 }
 0x2d5   : > { %v5475_v39 = vpop.f32.mrf.mxu0  ;;  %v4179_v40 = vadd.f32 %v5473_v17, %v5469_v15 }
 0x2d6   : > { %v4180_v41 = vpop.f32.mrf.mxu1 }
 0x2d7   : > { %v5477_v11 = vpop.f32.mrf.mxu0 }
 0x2d8   : > { %v4181_v49 = vpop.f32.mrf.mxu1 }
 0x2d9   : > { %v5479_v19 = vpop.f32.mrf.mxu0 }
 0x2da   : > { %v4183_v54 = vpop.f32.mrf.mxu1 }
 0x2db   : > { %v5481_v30 = vpop.f32.mrf.mxu0 }
 0x2dc   : > { %v4184_v3 = vpop.f32.mrf.mxu1  ;;  %v4284_v35 = vadd.f32 %v5481_v30, %v5479_v19 }
 0x2dd   : > { %v5483_v58 = vpop.f32.mrf.mxu0  ;;  %v4185_v55 = vadd.f32 %v4184_v3, %v4183_v54 }
 0x2df   : > { %v4242_v42 = vpop.f32.mrf.mxu1  ;;  %v5485_v18 = vpop.f32.mrf.mxu0 }
 0x2e0   : > { %v4287_v12 = vadd.f32 %v5485_v18, %v5483_v58 }
 0x2e1   : > { %v4243_v31 = vpop.f32.mrf.mxu1  ;;  %v4288_v2 = vpop.f32.mrf.mxu0 }
 0x2e3   : > { %v4245_v50 = vpop.f32.mrf.mxu1  ;;  %v4289_v52 = vpop.f32.mrf.mxu0 }
 0x2e5   : > { %v4246_v5 = vpop.f32.mrf.mxu1  ;;  %v4291_v29 = vpop.f32.mrf.mxu0 }
 0x2e7   : > { %v4248_v57 = vpop.f32.mrf.mxu1  ;;  %v4292_v7 = vpop.f32.mrf.mxu0 }
 0x2e9   : > { %v4249_v45 = vpop.f32.mrf.mxu1  ;;  %v5487_v24 = vpop.f32.mrf.mxu0 }
 0x2ea   : > { %5642 = vst [vmem:[#allocation18_spill] sm:$0xff] %v5487_v24  ;;  %v4244_v24 = vadd.f32 %v4243_v31, %v4242_v42  ;;  %v3346_v42 = vadd.f32 %v4207_v62, %v3281_v36 }
 0x2eb   : > { %v4251_v16 = vpop.f32.mrf.mxu1  ;;  %v5489_v51 = vpop.f32.mrf.mxu0 }
 0x2ec   : > { %5643 = vst [vmem:[#allocation19_spill] sm:$0xff] %v5489_v51  ;;  %v4250_v51 = vadd.f32 %v4249_v45, %v4248_v57  ;;  %v4247_v57 = vadd.f32 %v4246_v5, %v4245_v50  ;;  %v3359_v5 = vadd.f32 %v4216_v47, %v3294_v21 }
 0x2ed   : > { %v4252_v61 = vpop.f32.mrf.mxu1  ;;  %v5491_v34 = vpop.f32.mrf.mxu0 }
 0x2ee   : > { %5644 = vst [vmem:[#allocation12_spill] sm:$0xff] %v5491_v34  ;;  %v4182_v34 = vadd.f32 %v4181_v49, %v4180_v41  ;;  %v4253_v6 = vadd.f32 %v4252_v61, %v4251_v16  ;;  %v4290_v49 = vadd.f32 %v4289_v52, %v4288_v2  ;;  %v3305_v2 = vadd.f32 %v4185_v55, %v3867_v13 }
 0x2ef   : > { %v4254_v44 = vpop.f32.mrf.mxu1  ;;  %v5498_v43 = vpop.f32.mrf.mxu0  ;;  %v3411_v50 = vadd.f32 %v4247_v57, %v3346_v42  ;;  %v4293_v52 = vadd.f32 %v4292_v7, %v4291_v29  ;;  %v3297_v16 = vadd.f32 %v4179_v40, %v3867_v13  ;;  %v4225_v61 = vadd.f32 %v5477_v11, %v5475_v39  ;;  %v5647_v7 = vld [vmem:[#allocation17_spill] sm:$0xff] }
 0x2f0   : > { %5646 = vst [vmem:[#allocation16_spill] sm:$0xff] %v5498_v43  ;;  %v3343_v43 = vadd.f32 %v4204_v33, %v3278_v8  ;;  %v3302_v63 = vadd.f32 %v4182_v34, %v3867_v13 }
 0x2f1   : > { %v4255_v23 = vpop.f32.mrf.mxu1  ;;  %v4300_v28 = vpop.f32.mrf.mxu0  ;;  %v3370_v60 = vadd.f32 %v4225_v61, %v3305_v2  ;;  %v3476_v13 = vadd.f32 %v4287_v12, %v3411_v50  ;;  %v5649_v18 = vld [vmem:[#allocation18_spill] sm:$0xff] }
 0x2f2   : > { %v3408_v41 = vadd.f32 %v4244_v24, %v3343_v43  ;;  %v4256_v27 = vadd.f32 %v4255_v23, %v4254_v44  ;;  %v3367_v15 = vadd.f32 %v4222_v14, %v3302_v63  ;;  %v4219_v44 = vadd.f32 %v5647_v7, %v5463_v59 }
 0x2f3   : > { %v5496_v9 = vpop.f32.mrf.mxu1  ;;  %v4301_v31 = vpop.f32.mrf.mxu0  ;;  %v5650_v43 = vld [vmem:[#allocation19_spill] sm:$0xff] }
 0x2f4   : > { %5645 = vst [vmem:[#allocation13_spill] sm:$0xff] %v5496_v9  ;;  %v3416_v9 = vadd.f32 %v4250_v51, %v3351_v10  ;;  %v3419_v10 = vadd.f32 %v4253_v6, %v3354_v53  ;;  %v3473_v24 = vadd.f32 %v4284_v35, %v3408_v41  ;;  %v3424_v23 = vadd.f32 %v4256_v27, %v3359_v5 }
 0x2f5   : > { %v4258_v26 = vpop.f32.mrf.mxu1  ;;  %v4303_v1 = vpop.f32.mrf.mxu0  ;;  %v4302_v39 = vadd.f32 %v4301_v31, %v4300_v28  ;;  %v4296_v8 = vadd.f32 %v5650_v43, %v5649_v18  ;;  %v3362_v25 = vadd.f32 %v4219_v44, %v3297_v16  ;;  %v5651_v57 = vld [vmem:[#allocation12_spill] sm:$0xff] }
 0x2f6   : > { %v3481_v3 = vadd.f32 %v4290_v49, %v3416_v9  ;;  %v3484_v30 = vadd.f32 %v4293_v52, %v3419_v10 }
 0x2f7   : > { %v4260_v37 = vpop.f32.mrf.mxu1  ;;  %v4304_v59 = vpop.f32.mrf.mxu0  ;;  %v3489_v4 = vadd.f32 %v4296_v8, %v3424_v23  ;;  %v5652_v53 = vld [vmem:[#allocation16_spill] sm:$0xff] }
 0x2f8   : > { %v4305_v28 = vadd.f32 %v4304_v59, %v4303_v1 }
 0x2f9   : > { %v4261_v38 = vpop.f32.mrf.mxu1 }
 0x2fa   : > { %v4262_v54 = vadd.f32 %v4261_v38, %v4260_v37 }
 0x2fb   : > { %v4263_v0 = vpop.f32.mrf.mxu1  ;;  %v5648_v22 = vld [vmem:[#allocation13_spill] sm:$0xff] }
 0x2fc   : > { %v3432_v51 = vadd.f32 %v4262_v54, %v3367_v15  ;;  %v4259_v20 = vadd.f32 %v4258_v26, %v5648_v22 }
 0x2fd   : > { %v4264_v45 = vpop.f32.mrf.mxu1 }
 0x2fe   : > { %v4265_v34 = vadd.f32 %v4264_v45, %v4263_v0  ;;  %v3497_v32 = vadd.f32 %v4302_v39, %v3432_v51  ;;  %v3427_v6 = vadd.f32 %v4259_v20, %v3362_v25  ;;  %v4299_v0 = vadd.f32 %v5652_v53, %v5651_v57 }
 0x2ff   : > { %v4360_v56 = vpop.f32.mrf.mxu1 }
 0x300   : > { %v3546_v17 = vadd.f32 %v4360_v56, %v3481_v3  ;;  %v3435_v48 = vadd.f32 %v4265_v34, %v3370_v60  ;;  %v3492_v42 = vadd.f32 %v4299_v0, %v3427_v6 }
 0x301   : > { %v3537_v19 = vpop.f32.mrf.mxu1 }
 0x302   : > { %v3570_v46 = vmax.f32 %v3546_v17, 0.0  ;;  %v3538_v29 = vadd.f32 %v3537_v19, %v3473_v24  ;;  %v3500_v41 = vadd.f32 %v4305_v28, %v3435_v48 }
 0x303   : > { %v4361_v9 = vpop.f32.mrf.mxu1 }
 0x304   : > { %3578 = vst [vmem:[%s5521_s12 + $0x10] sm:$0xff] %v3570_v46  ;;  %v3568_v11 = vmax.f32 %v3538_v29, 0.0  ;;  %v3549_v58 = vadd.f32 %v4361_v9, %v3484_v30 }
 0x305   : > { %v3540_v33 = vpop.f32.mrf.mxu1 }
 0x306   : > { %3576 = vst [vmem:[%s5521_s12] sm:$0xff] %v3568_v11  ;;  %v3571_v37 = vmax.f32 %v3549_v58, 0.0  ;;  %v3541_v26 = vadd.f32 %v3540_v33, %v3476_v13 }
 0x307   : > { %v4364_v36 = vpop.f32.mrf.mxu1 }
 0x308   : > { %3579 = vst [vmem:[%s5521_s12 + $0x18] sm:$0xff] %v3571_v37  ;;  %v3569_v38 = vmax.f32 %v3541_v26, 0.0  ;;  %v3562_v62 = vadd.f32 %v4364_v36, %v3497_v32 }
 0x309   : > { %v3553_v55 = vpop.f32.mrf.mxu1 }
 0x30a   : > { %3577 = vst [vmem:[%s5521_s12 + $0x8] sm:$0xff] %v3569_v38  ;;  %v3574_v21 = vmax.f32 %v3562_v62, 0.0  ;;  %v3554_v63 = vadd.f32 %v3553_v55, %v3489_v4 }
 0x30b   : > { %v4365_v49 = vpop.f32.mrf.mxu1 }
 0x30c   : > { %3582 = vst [vmem:[%s5521_s12 + $0x30] sm:$0xff] %v3574_v21  ;;  %v3572_v47 = vmax.f32 %v3554_v63, 0.0  ;;  %v3565_v40 = vadd.f32 %v4365_v49, %v3500_v41 }
 0x30d   : > { %v3556_v10 = vpop.f32.mrf.mxu1 }
 0x30e   : > { %3580 = vst [vmem:[%s5521_s12 + $0x20] sm:$0xff] %v3572_v47  ;;  %v3575_v31 = vmax.f32 %v3565_v40, 0.0  ;;  %v3557_v45 = vadd.f32 %v3556_v10, %v3492_v42 }
 0x310   : > { %3583 = vst [vmem:[%s5521_s12 + $0x38] sm:$0xff] %v3575_v31  ;;  %v3573_v14 = vmax.f32 %v3557_v45, 0.0 }
 0x312   : > { %3581 = vst [vmem:[%s5521_s12 + $0x28] sm:$0xff] %v3573_v14 }
 0x313   : > { %4678 = shalt.err (!%p4675_p9)
}
 0x314   : > { %s4679_s24 = scalar_lea.hbm %s5540_s13, 1024  ;;  %s4683_s10 = scalar_lea.hbm %s5590_s5, 2048 }
 0x315   : > { %p4680_p13 = scmp.ne.s32.totalorder %s5540_s13, %s4679_s24  ;;  %p4684_p4 = scmp.lt.s32.totalorder %s5540_s13, %s5590_s5 }
 0x316   : > { %p4685_p8 = scmp.lt.s32.totalorder %s4683_s10, %s4679_s24 }
 0x317   : > { %p4681_p5 = pnand %p4680_p13, %p5653_p10 }
 0x318   : > { %p4686_p3 = por %p4685_p8, %p4684_p4 }
 0x319   : > { %p4682_p0 = pneg %p4681_p5 }
 0x31b   : > { %p4687_p11 = pnand %p4686_p3, %p4682_p0 }
 0x31d   : > { %4690 = shalt.err (!%p4687_p11)
}
 0x31e   : > { %s4745_s6 = smov 128   ;;  %s4746_s7 = smov 8  }
 0x31f   : > { %4376 = dma.vmem_to_hbm [thread:$0]  (%p5653_p10), %s5534_s28, 1024, %s5540_s13, %s3585_s14, %s4745_s6, %s4745_s6, %s4746_s7  }
 0x320 PF: > { %s3613_s9 = sand.u32 1, %s4721_s18   ;;  %p5654_p1 = scmp.ne.s32.totalorder %s5608_s25, 0 }
 0x321   : > { %p5655_p2 = scmp.ge.s32.totalorder %s4733_s21, 2  ;;  %s3614_s17 = scalar_lea.sflag [#allocation4], %s3613_s9 }
 0x323   : > { %p4390_p6 = pnand %p5655_p2, %p5654_p1 }
 0x325   : > { %p4391_p12 = pneg %p4390_p6 }
 0x327   : > { %4716 = dma.done.wait (%p4391_p12), %s3614_s17, 1024  }
 0x328   : > { %4718 = vsyncadd (%p4391_p12), %s3614_s17, 4294966272  ;;  %p19_p7 = scmp.ge.s32.totalorder %s4849_s15, 4   ;;  %s5656_s18 = smov %s4725_s19 }
 0x329   : > { %s5657_s19 = smov %s4729_s20  ;;  %s5658_s20 = smov %s4865_s27 }
 0x32a   : > { %s5659_s21 = smov %s4849_s15  ;;  %21 = sbr.rel (!%p19_p7) target bundleno = 6 (0x6), region = 93 }
 0x32f   :  { %3619 = vsyncpa [#allocation3], 1 }
 0x330   :  { %3621 = vsyncpa [#allocation3 + $0x1], 1 }
 0x331   :  { %3622 = vsyncpa [#allocation6], 1 }
 0x332   :  { %3623 = vsyncpa [#allocation4], 1 }
 0x333   :  { %3625 = vsyncpa [#allocation4 + $0x1], 1 }

</bundles_post_ra>
